<compile_context>
chip_gen: v6e
topology: v6e:2x2x1
jax: 0.10.0
libtpu: 0.0.40
codegen_flags: <defaults>
</compile_context>

<pallas_src>
import functools

import jax
import jax.numpy as jnp
from jax.experimental import pallas as pl
from jax.experimental.pallas import tpu as pltpu

_TARGET_TM = 256                 # row tile for the [B*S, C] kernels (sweep 256-512)
_VMEM_LIMIT = 64 * 1024 * 1024   # fits every generation (v7x physical VMEM = 64 MiB)
_NEG_BIG = 1e30


def _compiler_params(ndims=1):
    return pltpu.CompilerParams(
        dimension_semantics=("parallel",) * ndims,
        vmem_limit_bytes=_VMEM_LIMIT)


# ----------------------------------------------------------------------------- kernels
def _linear_kernel(x_ref, w_ref, b_ref, o_ref, *, activation):
    """o = act(x @ w + b).  bf16 MXU inputs, f32 accumulation."""
    y = jnp.dot(x_ref[...].astype(jnp.bfloat16), w_ref[...].astype(jnp.bfloat16),
                preferred_element_type=jnp.float32) + b_ref[...]
    if activation == "relu":
        y = jnp.maximum(y, 0.0)
    o_ref[...] = y.astype(o_ref.dtype)


def _attn_block_kernel(qkv_ref, x_ref, bias_ref, wo_ref, bo_ref, g_ref, bln_ref,
                       o_ref, *, heads, scale, eps):
    """Fused per-batch: MHA (in-kernel head split) + out-proj + residual + LayerNorm.

    qkv_ref: [1, S, 3*hid]; x_ref: [1, S, hid]; bias_ref: [1, 1, S] additive key mask.
    """
    hid = x_ref.shape[2]
    d = hid // heads

    qkv = qkv_ref[0]               # [S, 3*hid] f32
    bias = bias_ref[0]             # [1, S]

    ctx_heads = []
    for h in range(heads):         # heads is small & static -> unrolled
        q_h = qkv[:, h * d:(h + 1) * d].astype(jnp.bfloat16)
        k_h = qkv[:, hid + h * d: hid + (h + 1) * d].astype(jnp.bfloat16)
        v_h = qkv[:, 2 * hid + h * d: 2 * hid + (h + 1) * d].astype(jnp.bfloat16)
        # scores = q_h @ k_h^T (contract the head dim; no explicit transpose)
        s = jax.lax.dot_general(q_h, k_h, (((1,), (1,)), ((), ())),
                                preferred_element_type=jnp.float32)
        s = s * scale + bias                                   # additive key mask
        m = jnp.max(s, axis=-1, keepdims=True)
        e = jnp.exp(s - m)
        p = e * pl.reciprocal(jnp.sum(e, axis=-1, keepdims=True), approx=True)
        ctx_heads.append(jnp.dot(p.astype(jnp.bfloat16), v_h,
                                 preferred_element_type=jnp.float32))
    ctx = jnp.concatenate(ctx_heads, axis=-1)                  # [S, hid]

    att = jnp.dot(ctx.astype(jnp.bfloat16), wo_ref[...].astype(jnp.bfloat16),
                  preferred_element_type=jnp.float32) + bo_ref[...]
    r = x_ref[0] + att
    mean = jnp.mean(r, axis=-1, keepdims=True)
    var = jnp.mean((r - mean) ** 2, axis=-1, keepdims=True)
    o_ref[0] = ((r - mean) * jax.lax.rsqrt(var + eps) * g_ref[...]
                + bln_ref[...]).astype(o_ref.dtype)


def _ffn_block_kernel(x_ref, w1_ref, b1_ref, w2_ref, b2_ref, g_ref, bln_ref, o_ref,
                      *, eps):
    """Fused FFN: o = LayerNorm(x + relu(x@w1+b1)@w2 + b2); [tm, ffn] stays in VMEM."""
    x = x_ref[...]
    h = jnp.dot(x.astype(jnp.bfloat16), w1_ref[...].astype(jnp.bfloat16),
                preferred_element_type=jnp.float32) + b1_ref[...]
    h = jnp.maximum(h, 0.0)
    y = jnp.dot(h.astype(jnp.bfloat16), w2_ref[...].astype(jnp.bfloat16),
                preferred_element_type=jnp.float32) + b2_ref[...]
    r = x + y
    mean = jnp.mean(r, axis=-1, keepdims=True)
    var = jnp.mean((r - mean) ** 2, axis=-1, keepdims=True)
    o_ref[...] = ((r - mean) * jax.lax.rsqrt(var + eps) * g_ref[...]
                  + bln_ref[...]).astype(o_ref.dtype)


def _out_norm_kernel(x_ref, w_ref, b_ref, m_ref, o_ref):
    """Fused tail: y = x@w+b; o = y / max(||y||_2, 1e-12) * mask."""
    y = jnp.dot(x_ref[...].astype(jnp.bfloat16), w_ref[...].astype(jnp.bfloat16),
                preferred_element_type=jnp.float32) + b_ref[...]
    ssq = jnp.sum(y * y, axis=-1, keepdims=True)
    inv = jax.lax.rsqrt(jnp.maximum(ssq, 1e-24))   # == 1 / max(||y||, 1e-12)
    o_ref[...] = (y * inv * m_ref[...]).astype(o_ref.dtype)


# ----------------------------------------------------------------------------- wrappers
def _row_tiles(n):
    """Pick a row tile: full-extent block for small n, 256-row tiles (+pad) otherwise."""
    if n <= _TARGET_TM:
        return n, n
    pad_n = ((n + _TARGET_TM - 1) // _TARGET_TM) * _TARGET_TM
    return _TARGET_TM, pad_n


def _pad_rows(x, n_pad):
    n = x.shape[0]
    return x if n == n_pad else jnp.pad(x, ((0, n_pad - n), (0, 0)))


def pallas_linear(x2d, w, b, activation=None):
    n, cin = x2d.shape
    cout = w.shape[1]
    tm, n_pad = _row_tiles(n)
    xp = _pad_rows(x2d, n_pad)
    kernel = functools.partial(_linear_kernel, activation=activation)
    out = pl.pallas_call(
        kernel,
        out_shape=jax.ShapeDtypeStruct((n_pad, cout), jnp.float32),
        grid=(n_pad // tm,),
        in_specs=[
            pl.BlockSpec((tm, cin), lambda i: (i, 0)),
            pl.BlockSpec((cin, cout), lambda i: (0, 0)),
            pl.BlockSpec((1, cout), lambda i: (0, 0)),
        ],
        out_specs=pl.BlockSpec((tm, cout), lambda i: (i, 0)),
        compiler_params=_compiler_params(),
    )(xp, w, b.reshape(1, cout))
    return out[:n] if n_pad != n else out


def pallas_attn_block(qkv, x, bias, wo, bo, gamma, beta, heads, eps=1e-5):
    B, S, hid = x.shape
    d = hid // heads
    scale = 1.0 / (d ** 0.5)
    kernel = functools.partial(_attn_block_kernel, heads=heads, scale=scale, eps=eps)
    return pl.pallas_call(
        kernel,
        out_shape=jax.ShapeDtypeStruct((B, S, hid), jnp.float32),
        grid=(B,),
        in_specs=[
            pl.BlockSpec((1, S, 3 * hid), lambda i: (i, 0, 0)),
            pl.BlockSpec((1, S, hid), lambda i: (i, 0, 0)),
            pl.BlockSpec((1, 1, S), lambda i: (i, 0, 0)),
            pl.BlockSpec((hid, hid), lambda i: (0, 0)),
            pl.BlockSpec((1, hid), lambda i: (0, 0)),
            pl.BlockSpec((1, hid), lambda i: (0, 0)),
            pl.BlockSpec((1, hid), lambda i: (0, 0)),
        ],
        out_specs=pl.BlockSpec((1, S, hid), lambda i: (i, 0, 0)),
        compiler_params=_compiler_params(),
    )(qkv, x, bias, wo, bo.reshape(1, hid), gamma.reshape(1, hid), beta.reshape(1, hid))


def pallas_ffn_block(x2d, w1, b1, w2, b2, gamma, beta, eps=1e-5):
    n, hid = x2d.shape
    ffn = w1.shape[1]
    tm, n_pad = _row_tiles(n)
    xp = _pad_rows(x2d, n_pad)
    kernel = functools.partial(_ffn_block_kernel, eps=eps)
    out = pl.pallas_call(
        kernel,
        out_shape=jax.ShapeDtypeStruct((n_pad, hid), jnp.float32),
        grid=(n_pad // tm,),
        in_specs=[
            pl.BlockSpec((tm, hid), lambda i: (i, 0)),
            pl.BlockSpec((hid, ffn), lambda i: (0, 0)),
            pl.BlockSpec((1, ffn), lambda i: (0, 0)),
            pl.BlockSpec((ffn, hid), lambda i: (0, 0)),
            pl.BlockSpec((1, hid), lambda i: (0, 0)),
            pl.BlockSpec((1, hid), lambda i: (0, 0)),
            pl.BlockSpec((1, hid), lambda i: (0, 0)),
        ],
        out_specs=pl.BlockSpec((tm, hid), lambda i: (i, 0)),
        compiler_params=_compiler_params(),
    )(xp, w1, b1.reshape(1, ffn), w2, b2.reshape(1, hid),
      gamma.reshape(1, hid), beta.reshape(1, hid))
    return out[:n] if n_pad != n else out


def pallas_out_norm(x2d, w, b, mask_col):
    n, hid = x2d.shape
    cout = w.shape[1]
    tm, n_pad = _row_tiles(n)
    xp = _pad_rows(x2d, n_pad)
    mp = _pad_rows(mask_col, n_pad)
    out = pl.pallas_call(
        _out_norm_kernel,
        out_shape=jax.ShapeDtypeStruct((n_pad, cout), jnp.float32),
        grid=(n_pad // tm,),
        in_specs=[
            pl.BlockSpec((tm, hid), lambda i: (i, 0)),
            pl.BlockSpec((hid, cout), lambda i: (0, 0)),
            pl.BlockSpec((1, cout), lambda i: (0, 0)),
            pl.BlockSpec((tm, 1), lambda i: (i, 0)),
        ],
        out_specs=pl.BlockSpec((tm, cout), lambda i: (i, 0)),
        compiler_params=_compiler_params(),
    )(xp, w, b.reshape(1, cout), mp)
    return out[:n] if n_pad != n else out


# ----------------------------------------------------------------------------- model
def init_params(key, channels, hiddens, heads, ffn, blocks):
    assert hiddens % heads == 0
    keys = iter(jax.random.split(key, 2 + blocks * 4))

    def lin(kw, cin, cout):
        w = jax.random.normal(kw, (cin, cout), jnp.float32) / jnp.sqrt(cin)
        return {"w": w, "b": jnp.zeros((cout,), jnp.float32)}

    params = {
        "proj": lin(next(keys), channels, hiddens),
        "blocks": [],
        "out": lin(next(keys), hiddens, hiddens),
    }
    for _ in range(blocks):
        params["blocks"].append({
            "wqkv": lin(next(keys), hiddens, 3 * hiddens),   # fused q|k|v projection
            "wo": lin(next(keys), hiddens, hiddens),
            "ln1_g": jnp.ones((hiddens,), jnp.float32),
            "ln1_b": jnp.zeros((hiddens,), jnp.float32),
            "ffn1": lin(next(keys), hiddens, ffn),
            "ffn2": lin(next(keys), ffn, hiddens),
            "ln2_g": jnp.ones((hiddens,), jnp.float32),
            "ln2_b": jnp.zeros((hiddens,), jnp.float32),
        })
    return params


def linguistic_encoder_forward(params, inputs, mask, heads):
    """inputs: [B, S, channels] f32, mask: [B, S] f32 (or None) -> [B, S, hiddens]."""
    B, S, C = inputs.shape
    if mask is None:
        mask = jnp.ones((B, S), jnp.float32)
    mask = mask.astype(jnp.float32)

    hid = params["proj"]["w"].shape[1]
    n = B * S

    # additive key-mask bias, precomputed once (0 where kept, -1e30 where masked)
    bias = ((mask - 1.0) * _NEG_BIG).reshape(B, 1, S)

    # x = self.proj(inputs)
    x = pallas_linear(inputs.reshape(n, C), params["proj"]["w"], params["proj"]["b"])

    # SelfAttention(hiddens, heads, ffn, blocks) stack (post-LN transformer blocks)
    for blk in params["blocks"]:
        qkv = pallas_linear(x, blk["wqkv"]["w"], blk["wqkv"]["b"])          # [n, 3*hid]
        x = pallas_attn_block(qkv.reshape(B, S, 3 * hid), x.reshape(B, S, hid),
                              bias, blk["wo"]["w"], blk["wo"]["b"],
                              blk["ln1_g"], blk["ln1_b"], heads).reshape(n, hid)
        x = pallas_ffn_block(x, blk["ffn1"]["w"], blk["ffn1"]["b"],
                             blk["ffn2"]["w"], blk["ffn2"]["b"],
                             blk["ln2_g"], blk["ln2_b"])

    # trailing nn.Linear(hiddens, hiddens) + F.normalize(dim=-1) + mask, fused
    out = pallas_out_norm(x, params["out"]["w"], params["out"]["b"],
                          mask.reshape(n, 1))
    return out.reshape(B, S, hid)


# ----------------------------------------------------------------------------- main
if __name__ == "__main__":
    B, S = 2, 8
    channels, hiddens, heads, ffn, blocks = 4, 32, 4, 64, 2

    key = jax.random.PRNGKey(0)
    k_inp, k_par = jax.random.split(key)
    inputs = jax.random.normal(k_inp, (B, S, channels), jnp.float32)
    mask = jnp.ones((B, S), jnp.float32).at[1, 6:].set(0.0)

    params = init_params(k_par, channels, hiddens, heads, ffn, blocks)

    fwd = jax.jit(functools.partial(linguistic_encoder_forward, heads=heads))
    out = jax.block_until_ready(fwd(params, inputs, mask))

    assert out.shape == (B, S, hiddens)
    assert bool(jnp.all(jnp.isfinite(out)))
    # masked positions must be exactly zero
    assert bool(jnp.all(out[1, 6:] == 0.0))
    print("KERNEL_OK")
</pallas_src>

<mosaic_0001>
module attributes {stable_mosaic.version = 11 : i64} {
  func.func @_linear_kernel(%arg0: i32, %arg1: memref<16x32xf32, #tpu.memory_space<vmem>>, %arg2: memref<32x96xf32, #tpu.memory_space<vmem>>, %arg3: memref<1x96xf32, #tpu.memory_space<vmem>>, %arg4: memref<16x96xf32, #tpu.memory_space<vmem>>) attributes {dimension_semantics = [#tpu.dimension_semantics<parallel>], iteration_bounds = array<i64: 1>, scalar_prefetch = 0 : i64, scratch_operands = 0 : i64, tpu.core_type = #tpu.core_type<tc>, window_params = [{transform_indices = @transform_0, window_bounds = array<i64: 16, 32>}, {pipeline_mode = #tpu.pipeline_mode<synchronous>, transform_indices = @transform_1, window_bounds = array<i64: 32, 96>}, {pipeline_mode = #tpu.pipeline_mode<synchronous>, transform_indices = @transform_2, window_bounds = array<i64: 1, 96>}, {transform_indices = @transform_3, window_bounds = array<i64: 16, 96>}]} {
    %c0 = arith.constant 0 : index
    %c0_0 = arith.constant 0 : index
    %0 = vector.load %arg1[%c0, %c0_0] : memref<16x32xf32, #tpu.memory_space<vmem>>, vector<16x32xf32>
    %1 = arith.truncf %0 : vector<16x32xf32> to vector<16x32xbf16>
    %c0_1 = arith.constant 0 : index
    %c0_2 = arith.constant 0 : index
    %2 = vector.load %arg2[%c0_1, %c0_2] : memref<32x96xf32, #tpu.memory_space<vmem>>, vector<32x96xf32>
    %3 = arith.truncf %2 : vector<32x96xf32> to vector<32x96xbf16>
    %cst = arith.constant dense<0.000000e+00> : vector<16x96xf32>
    %4 = tpu.matmul %1, %3, %cst {dimension_numbers = #tpu.dot_dimension_numbers<[1], [0], [0], [1], [0, 0, 1, 1], [], []>} : vector<16x32xbf16>, vector<32x96xbf16>, vector<16x96xf32> -> vector<16x96xf32>
    %c0_3 = arith.constant 0 : index
    %c0_4 = arith.constant 0 : index
    %5 = vector.load %arg3[%c0_3, %c0_4] : memref<1x96xf32, #tpu.memory_space<vmem>>, vector<1x96xf32>
    %6 = vector.broadcast %5 : vector<1x96xf32> to vector<16x96xf32>
    %7 = arith.addf %4, %6 : vector<16x96xf32>
    %c0_5 = arith.constant 0 : index
    %c0_6 = arith.constant 0 : index
    %8 = vector.load %arg4[%c0_5, %c0_6] : memref<16x96xf32, #tpu.memory_space<vmem>>, vector<16x96xf32>
    tpu.vector_store %arg4[%c0_5, %c0_6], %7 {strides = array<i32>} : memref<16x96xf32, #tpu.memory_space<vmem>>, vector<16x96xf32>,
    return
  }
  func.func @transform_0(%arg0: i32) -> (i32, i32) {
    %c0_i32 = arith.constant 0 : i32
    %c0_i32_0 = arith.constant 0 : i32
    return %arg0, %c0_i32 : i32, i32
  }
  func.func @transform_1(%arg0: i32) -> (i32, i32) {
    %c0_i32 = arith.constant 0 : i32
    %c0_i32_0 = arith.constant 0 : i32
    %c0_i32_1 = arith.constant 0 : i32
    return %c0_i32, %c0_i32_0 : i32, i32
  }
  func.func @transform_2(%arg0: i32) -> (i32, i32) {
    %c0_i32 = arith.constant 0 : i32
    %c0_i32_0 = arith.constant 0 : i32
    %c0_i32_1 = arith.constant 0 : i32
    return %c0_i32, %c0_i32_0 : i32, i32
  }
  func.func @transform_3(%arg0: i32) -> (i32, i32) {
    %c0_i32 = arith.constant 0 : i32
    %c0_i32_0 = arith.constant 0 : i32
    return %arg0, %c0_i32 : i32, i32
  }
}

module attributes {stable_mosaic.version = 11 : i64} {
  func.func @_linear_kernel(%arg0: i32, %arg1: memref<16x4xf32, #tpu.memory_space<vmem>>, %arg2: memref<4x32xf32, #tpu.memory_space<vmem>>, %arg3: memref<1x32xf32, #tpu.memory_space<vmem>>, %arg4: memref<16x32xf32, #tpu.memory_space<vmem>>) attributes {dimension_semantics = [#tpu.dimension_semantics<parallel>], iteration_bounds = array<i64: 1>, scalar_prefetch = 0 : i64, scratch_operands = 0 : i64, tpu.core_type = #tpu.core_type<tc>, window_params = [{transform_indices = @transform_0, window_bounds = array<i64: 16, 4>}, {pipeline_mode = #tpu.pipeline_mode<synchronous>, transform_indices = @transform_1, window_bounds = array<i64: 4, 32>}, {pipeline_mode = #tpu.pipeline_mode<synchronous>, transform_indices = @transform_2, window_bounds = array<i64: 1, 32>}, {transform_indices = @transform_3, window_bounds = array<i64: 16, 32>}]} {
    %c0 = arith.constant 0 : index
    %c0_0 = arith.constant 0 : index
    %0 = vector.load %arg1[%c0, %c0_0] : memref<16x4xf32, #tpu.memory_space<vmem>>, vector<16x4xf32>
    %1 = arith.truncf %0 : vector<16x4xf32> to vector<16x4xbf16>
    %c0_1 = arith.constant 0 : index
    %c0_2 = arith.constant 0 : index
    %2 = vector.load %arg2[%c0_1, %c0_2] : memref<4x32xf32, #tpu.memory_space<vmem>>, vector<4x32xf32>
    %3 = arith.truncf %2 : vector<4x32xf32> to vector<4x32xbf16>
    %cst = arith.constant dense<0.000000e+00> : vector<16x32xf32>
    %4 = tpu.matmul %1, %3, %cst {dimension_numbers = #tpu.dot_dimension_numbers<[1], [0], [0], [1], [0, 0, 1, 1], [], []>} : vector<16x4xbf16>, vector<4x32xbf16>, vector<16x32xf32> -> vector<16x32xf32>
    %c0_3 = arith.constant 0 : index
    %c0_4 = arith.constant 0 : index
    %5 = vector.load %arg3[%c0_3, %c0_4] : memref<1x32xf32, #tpu.memory_space<vmem>>, vector<1x32xf32>
    %6 = vector.broadcast %5 : vector<1x32xf32> to vector<16x32xf32>
    %7 = arith.addf %4, %6 : vector<16x32xf32>
    %c0_5 = arith.constant 0 : index
    %c0_6 = arith.constant 0 : index
    %8 = vector.load %arg4[%c0_5, %c0_6] : memref<16x32xf32, #tpu.memory_space<vmem>>, vector<16x32xf32>
    tpu.vector_store %arg4[%c0_5, %c0_6], %7 {strides = array<i32>} : memref<16x32xf32, #tpu.memory_space<vmem>>, vector<16x32xf32>,
    return
  }
  func.func @transform_0(%arg0: i32) -> (i32, i32) {
    %c0_i32 = arith.constant 0 : i32
    %c0_i32_0 = arith.constant 0 : i32
    return %arg0, %c0_i32 : i32, i32
  }
  func.func @transform_1(%arg0: i32) -> (i32, i32) {
    %c0_i32 = arith.constant 0 : i32
    %c0_i32_0 = arith.constant 0 : i32
    %c0_i32_1 = arith.constant 0 : i32
    return %c0_i32, %c0_i32_0 : i32, i32
  }
  func.func @transform_2(%arg0: i32) -> (i32, i32) {
    %c0_i32 = arith.constant 0 : i32
    %c0_i32_0 = arith.constant 0 : i32
    %c0_i32_1 = arith.constant 0 : i32
    return %c0_i32, %c0_i32_0 : i32, i32
  }
  func.func @transform_3(%arg0: i32) -> (i32, i32) {
    %c0_i32 = arith.constant 0 : i32
    %c0_i32_0 = arith.constant 0 : i32
    return %arg0, %c0_i32 : i32, i32
  }
}

module attributes {stable_mosaic.version = 11 : i64} {
  func.func @_attn_block_kernel(%arg0: i32, %arg1: memref<1x8x96xf32, #tpu.memory_space<vmem>>, %arg2: memref<1x8x32xf32, #tpu.memory_space<vmem>>, %arg3: memref<1x1x8xf32, #tpu.memory_space<vmem>>, %arg4: memref<32x32xf32, #tpu.memory_space<vmem>>, %arg5: memref<1x32xf32, #tpu.memory_space<vmem>>, %arg6: memref<1x32xf32, #tpu.memory_space<vmem>>, %arg7: memref<1x32xf32, #tpu.memory_space<vmem>>, %arg8: memref<1x8x32xf32, #tpu.memory_space<vmem>>) attributes {dimension_semantics = [#tpu.dimension_semantics<parallel>], iteration_bounds = array<i64: 2>, scalar_prefetch = 0 : i64, scratch_operands = 0 : i64, tpu.core_type = #tpu.core_type<tc>, window_params = [{transform_indices = @transform_0, window_bounds = array<i64: 1, 8, 96>}, {transform_indices = @transform_1, window_bounds = array<i64: 1, 8, 32>}, {transform_indices = @transform_2, window_bounds = array<i64: 1, 1, 8>}, {pipeline_mode = #tpu.pipeline_mode<synchronous>, transform_indices = @transform_3, window_bounds = array<i64: 32, 32>}, {pipeline_mode = #tpu.pipeline_mode<synchronous>, transform_indices = @transform_4, window_bounds = array<i64: 1, 32>}, {pipeline_mode = #tpu.pipeline_mode<synchronous>, transform_indices = @transform_5, window_bounds = array<i64: 1, 32>}, {pipeline_mode = #tpu.pipeline_mode<synchronous>, transform_indices = @transform_6, window_bounds = array<i64: 1, 32>}, {transform_indices = @transform_7, window_bounds = array<i64: 1, 8, 32>}]} {
    %c0 = arith.constant 0 : index
    %c0_0 = arith.constant 0 : index
    %c0_1 = arith.constant 0 : index
    %0 = vector.load %arg1[%c0, %c0_0, %c0_1] : memref<1x8x96xf32, #tpu.memory_space<vmem>>, vector<1x8x96xf32>
    %1 = vector.shape_cast %0 : vector<1x8x96xf32> to vector<8x96xf32>
    %c0_2 = arith.constant 0 : index
    %c0_3 = arith.constant 0 : index
    %c0_4 = arith.constant 0 : index
    %2 = vector.load %arg3[%c0_2, %c0_3, %c0_4] : memref<1x1x8xf32, #tpu.memory_space<vmem>>, vector<1x1x8xf32>
    %3 = vector.shape_cast %2 : vector<1x1x8xf32> to vector<1x8xf32>
    %4 = vector.extract_strided_slice %1 {offsets = [0, 0], sizes = [8, 8], strides = [1, 1]} : vector<8x96xf32> to vector<8x8xf32>
    %5 = arith.truncf %4 : vector<8x8xf32> to vector<8x8xbf16>
    %6 = vector.extract_strided_slice %1 {offsets = [0, 32], sizes = [8, 8], strides = [1, 1]} : vector<8x96xf32> to vector<8x8xf32>
    %7 = arith.truncf %6 : vector<8x8xf32> to vector<8x8xbf16>
    %8 = vector.extract_strided_slice %1 {offsets = [0, 64], sizes = [8, 8], strides = [1, 1]} : vector<8x96xf32> to vector<8x8xf32>
    %9 = arith.truncf %8 : vector<8x8xf32> to vector<8x8xbf16>
    %cst = arith.constant dense<0.000000e+00> : vector<8x8xf32>
    %10 = tpu.matmul %5, %7, %cst {dimension_numbers = #tpu.dot_dimension_numbers<[1], [1], [0], [0], [0, 0, 1, 0], [], []>} : vector<8x8xbf16>, vector<8x8xbf16>, vector<8x8xf32> -> vector<8x8xf32>
    %cst_5 = arith.constant 0.353553385 : f32
    %11 = vector.broadcast %cst_5 : f32 to vector<8x8xf32>
    %12 = arith.mulf %10, %11 : vector<8x8xf32>
    %13 = vector.broadcast %3 : vector<1x8xf32> to vector<8x8xf32>
    %14 = arith.addf %12, %13 : vector<8x8xf32>
    %cst_6 = arith.constant dense<0xFF800000> : vector<8xf32>
    %15 = vector.multi_reduction <maximumf>, %14, %cst_6 [1] : vector<8x8xf32> to vector<8xf32>
    %16 = vector.shape_cast %15 : vector<8xf32> to vector<8x1xf32>
    %17 = vector.broadcast %16 : vector<8x1xf32> to vector<8x8xf32>
    %18 = arith.subf %14, %17 : vector<8x8xf32>
    %19 = math.exp %18 : vector<8x8xf32>
    %cst_7 = arith.constant dense<0.000000e+00> : vector<8xf32>
    %20 = vector.multi_reduction <add>, %19, %cst_7 [1] : vector<8x8xf32> to vector<8xf32>
    %21 = vector.shape_cast %20 : vector<8xf32> to vector<8x1xf32>
    %22 = tpu.reciprocal %21 {approx = true} : vector<8x1xf32> -> vector<8x1xf32>
    %23 = vector.broadcast %22 : vector<8x1xf32> to vector<8x8xf32>
    %24 = arith.mulf %19, %23 : vector<8x8xf32>
    %25 = arith.truncf %24 : vector<8x8xf32> to vector<8x8xbf16>
    %cst_8 = arith.constant dense<0.000000e+00> : vector<8x8xf32>
    %26 = tpu.matmul %25, %9, %cst_8 {dimension_numbers = #tpu.dot_dimension_numbers<[1], [0], [0], [1], [0, 0, 1, 1], [], []>} : vector<8x8xbf16>, vector<8x8xbf16>, vector<8x8xf32> -> vector<8x8xf32>
    %27 = vector.extract_strided_slice %1 {offsets = [0, 8], sizes = [8, 8], strides = [1, 1]} : vector<8x96xf32> to vector<8x8xf32>
    %28 = arith.truncf %27 : vector<8x8xf32> to vector<8x8xbf16>
    %29 = vector.extract_strided_slice %1 {offsets = [0, 40], sizes = [8, 8], strides = [1, 1]} : vector<8x96xf32> to vector<8x8xf32>
    %30 = arith.truncf %29 : vector<8x8xf32> to vector<8x8xbf16>
    %31 = vector.extract_strided_slice %1 {offsets = [0, 72], sizes = [8, 8], strides = [1, 1]} : vector<8x96xf32> to vector<8x8xf32>
    %32 = arith.truncf %31 : vector<8x8xf32> to vector<8x8xbf16>
    %cst_9 = arith.constant dense<0.000000e+00> : vector<8x8xf32>
    %33 = tpu.matmul %28, %30, %cst_9 {dimension_numbers = #tpu.dot_dimension_numbers<[1], [1], [0], [0], [0, 0, 1, 0], [], []>} : vector<8x8xbf16>, vector<8x8xbf16>, vector<8x8xf32> -> vector<8x8xf32>
    %cst_10 = arith.constant 0.353553385 : f32
    %34 = vector.broadcast %cst_10 : f32 to vector<8x8xf32>
    %35 = arith.mulf %33, %34 : vector<8x8xf32>
    %36 = vector.broadcast %3 : vector<1x8xf32> to vector<8x8xf32>
    %37 = arith.addf %35, %36 : vector<8x8xf32>
    %cst_11 = arith.constant dense<0xFF800000> : vector<8xf32>
    %38 = vector.multi_reduction <maximumf>, %37, %cst_11 [1] : vector<8x8xf32> to vector<8xf32>
    %39 = vector.shape_cast %38 : vector<8xf32> to vector<8x1xf32>
    %40 = vector.broadcast %39 : vector<8x1xf32> to vector<8x8xf32>
    %41 = arith.subf %37, %40 : vector<8x8xf32>
    %42 = math.exp %41 : vector<8x8xf32>
    %cst_12 = arith.constant dense<0.000000e+00> : vector<8xf32>
    %43 = vector.multi_reduction <add>, %42, %cst_12 [1] : vector<8x8xf32> to vector<8xf32>
    %44 = vector.shape_cast %43 : vector<8xf32> to vector<8x1xf32>
    %45 = tpu.reciprocal %44 {approx = true} : vector<8x1xf32> -> vector<8x1xf32>
    %46 = vector.broadcast %45 : vector<8x1xf32> to vector<8x8xf32>
    %47 = arith.mulf %42, %46 : vector<8x8xf32>
    %48 = arith.truncf %47 : vector<8x8xf32> to vector<8x8xbf16>
    %cst_13 = arith.constant dense<0.000000e+00> : vector<8x8xf32>
    %49 = tpu.matmul %48, %32, %cst_13 {dimension_numbers = #tpu.dot_dimension_numbers<[1], [0], [0], [1], [0, 0, 1, 1], [], []>} : vector<8x8xbf16>, vector<8x8xbf16>, vector<8x8xf32> -> vector<8x8xf32>
    %50 = vector.extract_strided_slice %1 {offsets = [0, 16], sizes = [8, 8], strides = [1, 1]} : vector<8x96xf32> to vector<8x8xf32>
    %51 = arith.truncf %50 : vector<8x8xf32> to vector<8x8xbf16>
    %52 = vector.extract_strided_slice %1 {offsets = [0, 48], sizes = [8, 8], strides = [1, 1]} : vector<8x96xf32> to vector<8x8xf32>
    %53 = arith.truncf %52 : vector<8x8xf32> to vector<8x8xbf16>
    %54 = vector.extract_strided_slice %1 {offsets = [0, 80], sizes = [8, 8], strides = [1, 1]} : vector<8x96xf32> to vector<8x8xf32>
    %55 = arith.truncf %54 : vector<8x8xf32> to vector<8x8xbf16>
    %cst_14 = arith.constant dense<0.000000e+00> : vector<8x8xf32>
    %56 = tpu.matmul %51, %53, %cst_14 {dimension_numbers = #tpu.dot_dimension_numbers<[1], [1], [0], [0], [0, 0, 1, 0], [], []>} : vector<8x8xbf16>, vector<8x8xbf16>, vector<8x8xf32> -> vector<8x8xf32>
    %cst_15 = arith.constant 0.353553385 : f32
    %57 = vector.broadcast %cst_15 : f32 to vector<8x8xf32>
    %58 = arith.mulf %56, %57 : vector<8x8xf32>
    %59 = vector.broadcast %3 : vector<1x8xf32> to vector<8x8xf32>
    %60 = arith.addf %58, %59 : vector<8x8xf32>
    %cst_16 = arith.constant dense<0xFF800000> : vector<8xf32>
    %61 = vector.multi_reduction <maximumf>, %60, %cst_16 [1] : vector<8x8xf32> to vector<8xf32>
    %62 = vector.shape_cast %61 : vector<8xf32> to vector<8x1xf32>
    %63 = vector.broadcast %62 : vector<8x1xf32> to vector<8x8xf32>
    %64 = arith.subf %60, %63 : vector<8x8xf32>
    %65 = math.exp %64 : vector<8x8xf32>
    %cst_17 = arith.constant dense<0.000000e+00> : vector<8xf32>
    %66 = vector.multi_reduction <add>, %65, %cst_17 [1] : vector<8x8xf32> to vector<8xf32>
    %67 = vector.shape_cast %66 : vector<8xf32> to vector<8x1xf32>
    %68 = tpu.reciprocal %67 {approx = true} : vector<8x1xf32> -> vector<8x1xf32>
    %69 = vector.broadcast %68 : vector<8x1xf32> to vector<8x8xf32>
    %70 = arith.mulf %65, %69 : vector<8x8xf32>
    %71 = arith.truncf %70 : vector<8x8xf32> to vector<8x8xbf16>
    %cst_18 = arith.constant dense<0.000000e+00> : vector<8x8xf32>
    %72 = tpu.matmul %71, %55, %cst_18 {dimension_numbers = #tpu.dot_dimension_numbers<[1], [0], [0], [1], [0, 0, 1, 1], [], []>} : vector<8x8xbf16>, vector<8x8xbf16>, vector<8x8xf32> -> vector<8x8xf32>
    %73 = vector.extract_strided_slice %1 {offsets = [0, 24], sizes = [8, 8], strides = [1, 1]} : vector<8x96xf32> to vector<8x8xf32>
    %74 = arith.truncf %73 : vector<8x8xf32> to vector<8x8xbf16>
    %75 = vector.extract_strided_slice %1 {offsets = [0, 56], sizes = [8, 8], strides = [1, 1]} : vector<8x96xf32> to vector<8x8xf32>
    %76 = arith.truncf %75 : vector<8x8xf32> to vector<8x8xbf16>
    %77 = vector.extract_strided_slice %1 {offsets = [0, 88], sizes = [8, 8], strides = [1, 1]} : vector<8x96xf32> to vector<8x8xf32>
    %78 = arith.truncf %77 : vector<8x8xf32> to vector<8x8xbf16>
    %cst_19 = arith.constant dense<0.000000e+00> : vector<8x8xf32>
    %79 = tpu.matmul %74, %76, %cst_19 {dimension_numbers = #tpu.dot_dimension_numbers<[1], [1], [0], [0], [0, 0, 1, 0], [], []>} : vector<8x8xbf16>, vector<8x8xbf16>, vector<8x8xf32> -> vector<8x8xf32>
    %cst_20 = arith.constant 0.353553385 : f32
    %80 = vector.broadcast %cst_20 : f32 to vector<8x8xf32>
    %81 = arith.mulf %79, %80 : vector<8x8xf32>
    %82 = vector.broadcast %3 : vector<1x8xf32> to vector<8x8xf32>
    %83 = arith.addf %81, %82 : vector<8x8xf32>
    %cst_21 = arith.constant dense<0xFF800000> : vector<8xf32>
    %84 = vector.multi_reduction <maximumf>, %83, %cst_21 [1] : vector<8x8xf32> to vector<8xf32>
    %85 = vector.shape_cast %84 : vector<8xf32> to vector<8x1xf32>
    %86 = vector.broadcast %85 : vector<8x1xf32> to vector<8x8xf32>
    %87 = arith.subf %83, %86 : vector<8x8xf32>
    %88 = math.exp %87 : vector<8x8xf32>
    %cst_22 = arith.constant dense<0.000000e+00> : vector<8xf32>
    %89 = vector.multi_reduction <add>, %88, %cst_22 [1] : vector<8x8xf32> to vector<8xf32>
    %90 = vector.shape_cast %89 : vector<8xf32> to vector<8x1xf32>
    %91 = tpu.reciprocal %90 {approx = true} : vector<8x1xf32> -> vector<8x1xf32>
    %92 = vector.broadcast %91 : vector<8x1xf32> to vector<8x8xf32>
    %93 = arith.mulf %88, %92 : vector<8x8xf32>
    %94 = arith.truncf %93 : vector<8x8xf32> to vector<8x8xbf16>
    %cst_23 = arith.constant dense<0.000000e+00> : vector<8x8xf32>
    %95 = tpu.matmul %94, %78, %cst_23 {dimension_numbers = #tpu.dot_dimension_numbers<[1], [0], [0], [1], [0, 0, 1, 1], [], []>} : vector<8x8xbf16>, vector<8x8xbf16>, vector<8x8xf32> -> vector<8x8xf32>
    %96 = tpu.concatenate %26, %49, %72, %95 in 1 : vector<8x8xf32>, vector<8x8xf32>, vector<8x8xf32>, vector<8x8xf32> -> vector<8x32xf32>
    %97 = arith.truncf %96 : vector<8x32xf32> to vector<8x32xbf16>
    %c0_24 = arith.constant 0 : index
    %c0_25 = arith.constant 0 : index
    %98 = vector.load %arg4[%c0_24, %c0_25] : memref<32x32xf32, #tpu.memory_space<vmem>>, vector<32x32xf32>
    %99 = arith.truncf %98 : vector<32x32xf32> to vector<32x32xbf16>
    %cst_26 = arith.constant dense<0.000000e+00> : vector<8x32xf32>
    %100 = tpu.matmul %97, %99, %cst_26 {dimension_numbers = #tpu.dot_dimension_numbers<[1], [0], [0], [1], [0, 0, 1, 1], [], []>} : vector<8x32xbf16>, vector<32x32xbf16>, vector<8x32xf32> -> vector<8x32xf32>
    %c0_27 = arith.constant 0 : index
    %c0_28 = arith.constant 0 : index
    %101 = vector.load %arg5[%c0_27, %c0_28] : memref<1x32xf32, #tpu.memory_space<vmem>>, vector<1x32xf32>
    %102 = vector.broadcast %101 : vector<1x32xf32> to vector<8x32xf32>
    %103 = arith.addf %100, %102 : vector<8x32xf32>
    %c0_29 = arith.constant 0 : index
    %c0_30 = arith.constant 0 : index
    %c0_31 = arith.constant 0 : index
    %104 = vector.load %arg2[%c0_29, %c0_30, %c0_31] : memref<1x8x32xf32, #tpu.memory_space<vmem>>, vector<1x8x32xf32>
    %105 = vector.shape_cast %104 : vector<1x8x32xf32> to vector<8x32xf32>
    %106 = arith.addf %105, %103 : vector<8x32xf32>
    %cst_32 = arith.constant dense<0.000000e+00> : vector<8xf32>
    %107 = vector.multi_reduction <add>, %106, %cst_32 [1] : vector<8x32xf32> to vector<8xf32>
    %108 = vector.shape_cast %107 : vector<8xf32> to vector<8x1xf32>
    %cst_33 = arith.constant 3.200000e+01 : f32
    %109 = vector.broadcast %cst_33 : f32 to vector<8x1xf32>
    %110 = arith.divf %108, %109 : vector<8x1xf32>
    %111 = vector.broadcast %110 : vector<8x1xf32> to vector<8x32xf32>
    %112 = arith.subf %106, %111 : vector<8x32xf32>
    %113 = arith.mulf %112, %112 : vector<8x32xf32>
    %cst_34 = arith.constant dense<0.000000e+00> : vector<8xf32>
    %114 = vector.multi_reduction <add>, %113, %cst_34 [1] : vector<8x32xf32> to vector<8xf32>
    %115 = vector.shape_cast %114 : vector<8xf32> to vector<8x1xf32>
    %cst_35 = arith.constant 3.200000e+01 : f32
    %116 = vector.broadcast %cst_35 : f32 to vector<8x1xf32>
    %117 = arith.divf %115, %116 : vector<8x1xf32>
    %118 = vector.broadcast %110 : vector<8x1xf32> to vector<8x32xf32>
    %119 = arith.subf %106, %118 : vector<8x32xf32>
    %cst_36 = arith.constant 9.99999974E-6 : f32
    %120 = vector.broadcast %cst_36 : f32 to vector<8x1xf32>
    %121 = arith.addf %117, %120 : vector<8x1xf32>
    %122 = math.rsqrt %121 : vector<8x1xf32>
    %123 = vector.broadcast %122 : vector<8x1xf32> to vector<8x32xf32>
    %124 = arith.mulf %119, %123 : vector<8x32xf32>
    %c0_37 = arith.constant 0 : index
    %c0_38 = arith.constant 0 : index
    %125 = vector.load %arg6[%c0_37, %c0_38] : memref<1x32xf32, #tpu.memory_space<vmem>>, vector<1x32xf32>
    %126 = vector.broadcast %125 : vector<1x32xf32> to vector<8x32xf32>
    %127 = arith.mulf %124, %126 : vector<8x32xf32>
    %c0_39 = arith.constant 0 : index
    %c0_40 = arith.constant 0 : index
    %128 = vector.load %arg7[%c0_39, %c0_40] : memref<1x32xf32, #tpu.memory_space<vmem>>, vector<1x32xf32>
    %129 = vector.broadcast %128 : vector<1x32xf32> to vector<8x32xf32>
    %130 = arith.addf %127, %129 : vector<8x32xf32>
    %c0_41 = arith.constant 0 : index
    %c0_42 = arith.constant 0 : index
    %c0_43 = arith.constant 0 : index
    %131 = vector.load %arg8[%c0_41, %c0_42, %c0_43] : memref<1x8x32xf32, #tpu.memory_space<vmem>>, vector<1x8x32xf32>
    %132 = vector.shape_cast %131 : vector<1x8x32xf32> to vector<8x32xf32>
    %133 = vector.shape_cast %130 : vector<8x32xf32> to vector<1x8x32xf32>
    tpu.vector_store %arg8[%c0_41, %c0_42, %c0_43], %133 {strides = array<i32>} : memref<1x8x32xf32, #tpu.memory_space<vmem>>, vector<1x8x32xf32>,
    return
  }
  func.func @transform_0(%arg0: i32) -> (i32, i32, i32) {
    %c0_i32 = arith.constant 0 : i32
    %c0_i32_0 = arith.constant 0 : i32
    %c0_i32_1 = arith.constant 0 : i32
    return %arg0, %c0_i32, %c0_i32_0 : i32, i32, i32
  }
  func.func @transform_1(%arg0: i32) -> (i32, i32, i32) {
    %c0_i32 = arith.constant 0 : i32
    %c0_i32_0 = arith.constant 0 : i32
    %c0_i32_1 = arith.constant 0 : i32
    return %arg0, %c0_i32, %c0_i32_0 : i32, i32, i32
  }
  func.func @transform_2(%arg0: i32) -> (i32, i32, i32) {
    %c0_i32 = arith.constant 0 : i32
    %c0_i32_0 = arith.constant 0 : i32
    %c0_i32_1 = arith.constant 0 : i32
    return %arg0, %c0_i32, %c0_i32_0 : i32, i32, i32
  }
  func.func @transform_3(%arg0: i32) -> (i32, i32) {
    %c0_i32 = arith.constant 0 : i32
    %c0_i32_0 = arith.constant 0 : i32
    %c0_i32_1 = arith.constant 0 : i32
    return %c0_i32, %c0_i32_0 : i32, i32
  }
  func.func @transform_4(%arg0: i32) -> (i32, i32) {
    %c0_i32 = arith.constant 0 : i32
    %c0_i32_0 = arith.constant 0 : i32
    %c0_i32_1 = arith.constant 0 : i32
    return %c0_i32, %c0_i32_0 : i32, i32
  }
  func.func @transform_5(%arg0: i32) -> (i32, i32) {
    %c0_i32 = arith.constant 0 : i32
    %c0_i32_0 = arith.constant 0 : i32
    %c0_i32_1 = arith.constant 0 : i32
    return %c0_i32, %c0_i32_0 : i32, i32
  }
  func.func @transform_6(%arg0: i32) -> (i32, i32) {
    %c0_i32 = arith.constant 0 : i32
    %c0_i32_0 = arith.constant 0 : i32
    %c0_i32_1 = arith.constant 0 : i32
    return %c0_i32, %c0_i32_0 : i32, i32
  }
  func.func @transform_7(%arg0: i32) -> (i32, i32, i32) {
    %c0_i32 = arith.constant 0 : i32
    %c0_i32_0 = arith.constant 0 : i32
    %c0_i32_1 = arith.constant 0 : i32
    return %arg0, %c0_i32, %c0_i32_0 : i32, i32, i32
  }
}

module attributes {stable_mosaic.version = 11 : i64} {
  func.func @_ffn_block_kernel(%arg0: i32, %arg1: memref<16x32xf32, #tpu.memory_space<vmem>>, %arg2: memref<32x64xf32, #tpu.memory_space<vmem>>, %arg3: memref<1x64xf32, #tpu.memory_space<vmem>>, %arg4: memref<64x32xf32, #tpu.memory_space<vmem>>, %arg5: memref<1x32xf32, #tpu.memory_space<vmem>>, %arg6: memref<1x32xf32, #tpu.memory_space<vmem>>, %arg7: memref<1x32xf32, #tpu.memory_space<vmem>>, %arg8: memref<16x32xf32, #tpu.memory_space<vmem>>) attributes {dimension_semantics = [#tpu.dimension_semantics<parallel>], iteration_bounds = array<i64: 1>, scalar_prefetch = 0 : i64, scratch_operands = 0 : i64, tpu.core_type = #tpu.core_type<tc>, window_params = [{transform_indices = @transform_0, window_bounds = array<i64: 16, 32>}, {pipeline_mode = #tpu.pipeline_mode<synchronous>, transform_indices = @transform_1, window_bounds = array<i64: 32, 64>}, {pipeline_mode = #tpu.pipeline_mode<synchronous>, transform_indices = @transform_2, window_bounds = array<i64: 1, 64>}, {pipeline_mode = #tpu.pipeline_mode<synchronous>, transform_indices = @transform_3, window_bounds = array<i64: 64, 32>}, {pipeline_mode = #tpu.pipeline_mode<synchronous>, transform_indices = @transform_4, window_bounds = array<i64: 1, 32>}, {pipeline_mode = #tpu.pipeline_mode<synchronous>, transform_indices = @transform_5, window_bounds = array<i64: 1, 32>}, {pipeline_mode = #tpu.pipeline_mode<synchronous>, transform_indices = @transform_6, window_bounds = array<i64: 1, 32>}, {transform_indices = @transform_7, window_bounds = array<i64: 16, 32>}]} {
    %c0 = arith.constant 0 : index
    %c0_0 = arith.constant 0 : index
    %0 = vector.load %arg1[%c0, %c0_0] : memref<16x32xf32, #tpu.memory_space<vmem>>, vector<16x32xf32>
    %1 = arith.truncf %0 : vector<16x32xf32> to vector<16x32xbf16>
    %c0_1 = arith.constant 0 : index
    %c0_2 = arith.constant 0 : index
    %2 = vector.load %arg2[%c0_1, %c0_2] : memref<32x64xf32, #tpu.memory_space<vmem>>, vector<32x64xf32>
    %3 = arith.truncf %2 : vector<32x64xf32> to vector<32x64xbf16>
    %cst = arith.constant dense<0.000000e+00> : vector<16x64xf32>
    %4 = tpu.matmul %1, %3, %cst {dimension_numbers = #tpu.dot_dimension_numbers<[1], [0], [0], [1], [0, 0, 1, 1], [], []>} : vector<16x32xbf16>, vector<32x64xbf16>, vector<16x64xf32> -> vector<16x64xf32>
    %c0_3 = arith.constant 0 : index
    %c0_4 = arith.constant 0 : index
    %5 = vector.load %arg3[%c0_3, %c0_4] : memref<1x64xf32, #tpu.memory_space<vmem>>, vector<1x64xf32>
    %6 = vector.broadcast %5 : vector<1x64xf32> to vector<16x64xf32>
    %7 = arith.addf %4, %6 : vector<16x64xf32>
    %cst_5 = arith.constant 0.000000e+00 : f32
    %8 = vector.broadcast %cst_5 : f32 to vector<16x64xf32>
    %9 = arith.maximumf %7, %8 : vector<16x64xf32>
    %10 = arith.truncf %9 : vector<16x64xf32> to vector<16x64xbf16>
    %c0_6 = arith.constant 0 : index
    %c0_7 = arith.constant 0 : index
    %11 = vector.load %arg4[%c0_6, %c0_7] : memref<64x32xf32, #tpu.memory_space<vmem>>, vector<64x32xf32>
    %12 = arith.truncf %11 : vector<64x32xf32> to vector<64x32xbf16>
    %cst_8 = arith.constant dense<0.000000e+00> : vector<16x32xf32>
    %13 = tpu.matmul %10, %12, %cst_8 {dimension_numbers = #tpu.dot_dimension_numbers<[1], [0], [0], [1], [0, 0, 1, 1], [], []>} : vector<16x64xbf16>, vector<64x32xbf16>, vector<16x32xf32> -> vector<16x32xf32>
    %c0_9 = arith.constant 0 : index
    %c0_10 = arith.constant 0 : index
    %14 = vector.load %arg5[%c0_9, %c0_10] : memref<1x32xf32, #tpu.memory_space<vmem>>, vector<1x32xf32>
    %15 = vector.broadcast %14 : vector<1x32xf32> to vector<16x32xf32>
    %16 = arith.addf %13, %15 : vector<16x32xf32>
    %17 = arith.addf %0, %16 : vector<16x32xf32>
    %cst_11 = arith.constant dense<0.000000e+00> : vector<16xf32>
    %18 = vector.multi_reduction <add>, %17, %cst_11 [1] : vector<16x32xf32> to vector<16xf32>
    %19 = vector.shape_cast %18 : vector<16xf32> to vector<16x1xf32>
    %cst_12 = arith.constant 3.200000e+01 : f32
    %20 = vector.broadcast %cst_12 : f32 to vector<16x1xf32>
    %21 = arith.divf %19, %20 : vector<16x1xf32>
    %22 = vector.broadcast %21 : vector<16x1xf32> to vector<16x32xf32>
    %23 = arith.subf %17, %22 : vector<16x32xf32>
    %24 = arith.mulf %23, %23 : vector<16x32xf32>
    %cst_13 = arith.constant dense<0.000000e+00> : vector<16xf32>
    %25 = vector.multi_reduction <add>, %24, %cst_13 [1] : vector<16x32xf32> to vector<16xf32>
    %26 = vector.shape_cast %25 : vector<16xf32> to vector<16x1xf32>
    %cst_14 = arith.constant 3.200000e+01 : f32
    %27 = vector.broadcast %cst_14 : f32 to vector<16x1xf32>
    %28 = arith.divf %26, %27 : vector<16x1xf32>
    %29 = vector.broadcast %21 : vector<16x1xf32> to vector<16x32xf32>
    %30 = arith.subf %17, %29 : vector<16x32xf32>
    %cst_15 = arith.constant 9.99999974E-6 : f32
    %31 = vector.broadcast %cst_15 : f32 to vector<16x1xf32>
    %32 = arith.addf %28, %31 : vector<16x1xf32>
    %33 = math.rsqrt %32 : vector<16x1xf32>
    %34 = vector.broadcast %33 : vector<16x1xf32> to vector<16x32xf32>
    %35 = arith.mulf %30, %34 : vector<16x32xf32>
    %c0_16 = arith.constant 0 : index
    %c0_17 = arith.constant 0 : index
    %36 = vector.load %arg6[%c0_16, %c0_17] : memref<1x32xf32, #tpu.memory_space<vmem>>, vector<1x32xf32>
    %37 = vector.broadcast %36 : vector<1x32xf32> to vector<16x32xf32>
    %38 = arith.mulf %35, %37 : vector<16x32xf32>
    %c0_18 = arith.constant 0 : index
    %c0_19 = arith.constant 0 : index
    %39 = vector.load %arg7[%c0_18, %c0_19] : memref<1x32xf32, #tpu.memory_space<vmem>>, vector<1x32xf32>
    %40 = vector.broadcast %39 : vector<1x32xf32> to vector<16x32xf32>
    %41 = arith.addf %38, %40 : vector<16x32xf32>
    %c0_20 = arith.constant 0 : index
    %c0_21 = arith.constant 0 : index
    %42 = vector.load %arg8[%c0_20, %c0_21] : memref<16x32xf32, #tpu.memory_space<vmem>>, vector<16x32xf32>
    tpu.vector_store %arg8[%c0_20, %c0_21], %41 {strides = array<i32>} : memref<16x32xf32, #tpu.memory_space<vmem>>, vector<16x32xf32>,
    return
  }
  func.func @transform_0(%arg0: i32) -> (i32, i32) {
    %c0_i32 = arith.constant 0 : i32
    %c0_i32_0 = arith.constant 0 : i32
    return %arg0, %c0_i32 : i32, i32
  }
  func.func @transform_1(%arg0: i32) -> (i32, i32) {
    %c0_i32 = arith.constant 0 : i32
    %c0_i32_0 = arith.constant 0 : i32
    %c0_i32_1 = arith.constant 0 : i32
    return %c0_i32, %c0_i32_0 : i32, i32
  }
  func.func @transform_2(%arg0: i32) -> (i32, i32) {
    %c0_i32 = arith.constant 0 : i32
    %c0_i32_0 = arith.constant 0 : i32
    %c0_i32_1 = arith.constant 0 : i32
    return %c0_i32, %c0_i32_0 : i32, i32
  }
  func.func @transform_3(%arg0: i32) -> (i32, i32) {
    %c0_i32 = arith.constant 0 : i32
    %c0_i32_0 = arith.constant 0 : i32
    %c0_i32_1 = arith.constant 0 : i32
    return %c0_i32, %c0_i32_0 : i32, i32
  }
  func.func @transform_4(%arg0: i32) -> (i32, i32) {
    %c0_i32 = arith.constant 0 : i32
    %c0_i32_0 = arith.constant 0 : i32
    %c0_i32_1 = arith.constant 0 : i32
    return %c0_i32, %c0_i32_0 : i32, i32
  }
  func.func @transform_5(%arg0: i32) -> (i32, i32) {
    %c0_i32 = arith.constant 0 : i32
    %c0_i32_0 = arith.constant 0 : i32
    %c0_i32_1 = arith.constant 0 : i32
    return %c0_i32, %c0_i32_0 : i32, i32
  }
  func.func @transform_6(%arg0: i32) -> (i32, i32) {
    %c0_i32 = arith.constant 0 : i32
    %c0_i32_0 = arith.constant 0 : i32
    %c0_i32_1 = arith.constant 0 : i32
    return %c0_i32, %c0_i32_0 : i32, i32
  }
  func.func @transform_7(%arg0: i32) -> (i32, i32) {
    %c0_i32 = arith.constant 0 : i32
    %c0_i32_0 = arith.constant 0 : i32
    return %arg0, %c0_i32 : i32, i32
  }
}

module attributes {stable_mosaic.version = 11 : i64} {
  func.func @_out_norm_kernel(%arg0: i32, %arg1: memref<16x32xf32, #tpu.memory_space<vmem>>, %arg2: memref<32x32xf32, #tpu.memory_space<vmem>>, %arg3: memref<1x32xf32, #tpu.memory_space<vmem>>, %arg4: memref<16x1xf32, #tpu.memory_space<vmem>>, %arg5: memref<16x32xf32, #tpu.memory_space<vmem>>) attributes {dimension_semantics = [#tpu.dimension_semantics<parallel>], iteration_bounds = array<i64: 1>, scalar_prefetch = 0 : i64, scratch_operands = 0 : i64, tpu.core_type = #tpu.core_type<tc>, window_params = [{transform_indices = @transform_0, window_bounds = array<i64: 16, 32>}, {pipeline_mode = #tpu.pipeline_mode<synchronous>, transform_indices = @transform_1, window_bounds = array<i64: 32, 32>}, {pipeline_mode = #tpu.pipeline_mode<synchronous>, transform_indices = @transform_2, window_bounds = array<i64: 1, 32>}, {transform_indices = @transform_3, window_bounds = array<i64: 16, 1>}, {transform_indices = @transform_4, window_bounds = array<i64: 16, 32>}]} {
    %c0 = arith.constant 0 : index
    %c0_0 = arith.constant 0 : index
    %0 = vector.load %arg1[%c0, %c0_0] : memref<16x32xf32, #tpu.memory_space<vmem>>, vector<16x32xf32>
    %1 = arith.truncf %0 : vector<16x32xf32> to vector<16x32xbf16>
    %c0_1 = arith.constant 0 : index
    %c0_2 = arith.constant 0 : index
    %2 = vector.load %arg2[%c0_1, %c0_2] : memref<32x32xf32, #tpu.memory_space<vmem>>, vector<32x32xf32>
    %3 = arith.truncf %2 : vector<32x32xf32> to vector<32x32xbf16>
    %cst = arith.constant dense<0.000000e+00> : vector<16x32xf32>
    %4 = tpu.matmul %1, %3, %cst {dimension_numbers = #tpu.dot_dimension_numbers<[1], [0], [0], [1], [0, 0, 1, 1], [], []>} : vector<16x32xbf16>, vector<32x32xbf16>, vector<16x32xf32> -> vector<16x32xf32>
    %c0_3 = arith.constant 0 : index
    %c0_4 = arith.constant 0 : index
    %5 = vector.load %arg3[%c0_3, %c0_4] : memref<1x32xf32, #tpu.memory_space<vmem>>, vector<1x32xf32>
    %6 = vector.broadcast %5 : vector<1x32xf32> to vector<16x32xf32>
    %7 = arith.addf %4, %6 : vector<16x32xf32>
    %8 = arith.mulf %7, %7 : vector<16x32xf32>
    %cst_5 = arith.constant dense<0.000000e+00> : vector<16xf32>
    %9 = vector.multi_reduction <add>, %8, %cst_5 [1] : vector<16x32xf32> to vector<16xf32>
    %10 = vector.shape_cast %9 : vector<16xf32> to vector<16x1xf32>
    %cst_6 = arith.constant 1.000000e-24 : f32
    %11 = vector.broadcast %cst_6 : f32 to vector<16x1xf32>
    %12 = arith.maximumf %10, %11 : vector<16x1xf32>
    %13 = math.rsqrt %12 : vector<16x1xf32>
    %14 = vector.broadcast %13 : vector<16x1xf32> to vector<16x32xf32>
    %15 = arith.mulf %7, %14 : vector<16x32xf32>
    %c0_7 = arith.constant 0 : index
    %c0_8 = arith.constant 0 : index
    %16 = vector.load %arg4[%c0_7, %c0_8] : memref<16x1xf32, #tpu.memory_space<vmem>>, vector<16x1xf32>
    %17 = vector.broadcast %16 : vector<16x1xf32> to vector<16x32xf32>
    %18 = arith.mulf %15, %17 : vector<16x32xf32>
    %c0_9 = arith.constant 0 : index
    %c0_10 = arith.constant 0 : index
    %19 = vector.load %arg5[%c0_9, %c0_10] : memref<16x32xf32, #tpu.memory_space<vmem>>, vector<16x32xf32>
    tpu.vector_store %arg5[%c0_9, %c0_10], %18 {strides = array<i32>} : memref<16x32xf32, #tpu.memory_space<vmem>>, vector<16x32xf32>,
    return
  }
  func.func @transform_0(%arg0: i32) -> (i32, i32) {
    %c0_i32 = arith.constant 0 : i32
    %c0_i32_0 = arith.constant 0 : i32
    return %arg0, %c0_i32 : i32, i32
  }
  func.func @transform_1(%arg0: i32) -> (i32, i32) {
    %c0_i32 = arith.constant 0 : i32
    %c0_i32_0 = arith.constant 0 : i32
    %c0_i32_1 = arith.constant 0 : i32
    return %c0_i32, %c0_i32_0 : i32, i32
  }
  func.func @transform_2(%arg0: i32) -> (i32, i32) {
    %c0_i32 = arith.constant 0 : i32
    %c0_i32_0 = arith.constant 0 : i32
    %c0_i32_1 = arith.constant 0 : i32
    return %c0_i32, %c0_i32_0 : i32, i32
  }
  func.func @transform_3(%arg0: i32) -> (i32, i32) {
    %c0_i32 = arith.constant 0 : i32
    %c0_i32_0 = arith.constant 0 : i32
    return %arg0, %c0_i32 : i32, i32
  }
  func.func @transform_4(%arg0: i32) -> (i32, i32) {
    %c0_i32 = arith.constant 0 : i32
    %c0_i32_0 = arith.constant 0 : i32
    return %arg0, %c0_i32 : i32, i32
  }
}

</mosaic_0001>

<bundles_post_ra>
// kernel: linguistic_encoder_forward.9
= control target key start
LH: loop header
LB: loop body
LE: loop exit
PB: predicated region body
PF: predicated region fallthrough
CT: control target
= control target key end

     0   :  { %v98_v0 = vmov 0.0   ;;  %vm99_vm0 = vmmov 0   ;;  %vm31_vm1 = vcmask 261120   ;;  %vm76_vm2 = vcmask 785408   ;;  %s147_s1 = inlined_call_operand.vmem [shape: f32[32,96], index: 1, kind: input, shape index: {}]   ;;  %s148_s0 = inlined_call_operand.vmem [shape: f32[16,32], index: 0, kind: input, shape index: {}]   ;;  %s149_s2 = inlined_call_operand.vmem [shape: f32[1,96], index: 2, kind: input, shape index: {}]   ;;  %s150_s3 = inlined_call_operand.vmem [shape: f32[16,96], index: 3, kind: output, shape index: {}]  }
   0x1   :  { %88 = vmatprep.subr.bf16.mxu0 %v98_v0  ;;  %v20_v1 = vld [vmem:[%s147_s1 + $0x10] sm:$0xff]  ;;  %v21_v2 = vld [vmem:[%s147_s1 + $0x18] sm:$0xff]  ;;  %v18_v3 = vld [vmem:[%s147_s1] sm:$0xff]  ;;  %92 = vmatprep.mubr.msk.bf16.mxu0 %vm99_vm0, %v98_v0 }
   0x2   :  { %v23_v4 = vpack.c.bf16 %v21_v2, %v20_v1  ;;  %v19_v5 = vld [vmem:[%s147_s1 + $0x8] sm:$0xff]  ;;  %v15_v7 = vld [vmem:[%s148_s0] sm:$0xff] }
   0x3   :  { %v22_v6 = vpack.c.bf16 %v19_v5, %v18_v3  ;;  %v16_v8 = vld [vmem:[%s148_s0 + $0x8] sm:$0xff]  ;;  %v83_v10 = vld [vmem:[%s149_s2] ss:$0 sm:$0xff] }
   0x4   :  { %89 = vmatpush3.bf16.msra.mxu0 %v23_v4  ;;  %v17_v9 = vpack.c.bf16 %v16_v8, %v15_v7 }
   0x5   :  { %90 = vmatprep.subr.bf16.mxu0 %v98_v0 }
   0x8   :  { %91 = vmatpush3.bf16.msra.mxu0 %v22_v6 }
   0xb   :  { %93 = vmatmul.mubr.msk.bf16.vlgmr.msra.gmra.mxu0 %vm31_vm1, %v17_v9 }
  0xcb   :  { %v69_v11 = vpop.f32.mrf.mxu0 }
  0xcc   :  { %v70_v12 = vadd.f32 %v83_v10, %v69_v11 }
  0xcd   :  { %v94_v13 = vpop.f32.mrf.mxu0 }
  0xce   :  { %77 = vst.msk [vmem:[%s150_s3] sm:$0xff] %vm76_vm2, %v70_v12 }
  0xcf   :  { %v72_v14 = vpop.f32.mrf.mxu0 }
  0xd0   :  { %v73_v15 = vadd.f32 %v83_v10, %v72_v14 }
  0xd1   :  { %v95_v16 = vpop.f32.mrf.mxu0 }
  0xd2   :  { %78 = vst.msk [vmem:[%s150_s3 + $0x8] sm:$0xff] %vm76_vm2, %v73_v15 }

// kernel: linguistic_encoder_forward.8
= control target key start
LH: loop header
LB: loop body
LE: loop exit
PB: predicated region body
PF: predicated region fallthrough
CT: control target
= control target key end

     0   :  { %v95_v0 = vmov 0.0   ;;  %vm31_vm0 = vcmask 1041408   ;;  %vm96_vm1 = vmmov 0   ;;  %vm27_vm2 = vcmask 31744   ;;  %s135_s1 = inlined_call_operand.vmem [shape: f32[4,32], index: 1, kind: input, shape index: {}]   ;;  %s136_s0 = inlined_call_operand.vmem [shape: f32[16,4], index: 0, kind: input, shape index: {}]   ;;  %s137_s2 = inlined_call_operand.vmem [shape: f32[1,32], index: 2, kind: input, shape index: {}]   ;;  %s138_s3 = inlined_call_operand.vmem [shape: f32[16,32], index: 3, kind: output, shape index: {}]  }
   0x1   :  { %87 = vmatprep.subr.bf16.mxu0 %v95_v0  ;;  %v18_v1 = vld [vmem:[%s135_s1] sm:$0xf]  ;;  %89 = vmatprep.mubr.msk.bf16.mxu0 %vm96_vm1, %v95_v0  ;;  %v16_v3 = vld [vmem:[%s136_s0 + $0x8] sm:$0xff]  ;;  %vm76_vm3 = vcmask 261120  }
   0x2   :  { %v15_v2 = vld [vmem:[%s136_s0] sm:$0xff]  ;;  %v19_v4 = vpack.c.bf16 %v18_v1, %v18_v1 }
   0x3   :  { %v17_v6 = vpack.c.bf16 %v16_v3, %v15_v2  ;;  %v83_v7 = vld [vmem:[%s137_s2] ss:$0 sm:$0xff] }
   0x4   :  { %v33_v5 = vsel %vm31_vm0, %v19_v4, 0 }
   0x5   :  { %88 = vmatpush3.bf16.msra.mxu0 %v33_v5 }
   0x8   :  { %90 = vmatmul.mubr.msk.bf16.vlgmr.msra.gmra.mxu0 %vm27_vm2, %v17_v6 }
  0xc8   :  { %v69_v8 = vpop.f32.mrf.mxu0 }
  0xc9   :  { %v70_v9 = vadd.f32 %v83_v7, %v69_v8 }
  0xca   :  { %v91_v10 = vpop.f32.mrf.mxu0 }
  0xcb   :  { %77 = vst.msk [vmem:[%s138_s3] sm:$0xff] %vm76_vm3, %v70_v9 }
  0xcc   :  { %v72_v11 = vpop.f32.mrf.mxu0 }
  0xcd   :  { %v73_v12 = vadd.f32 %v83_v7, %v72_v11 }
  0xce   :  { %v92_v13 = vpop.f32.mrf.mxu0 }
  0xcf   :  { %78 = vst.msk [vmem:[%s138_s3 + $0x8] sm:$0xff] %vm76_vm3, %v73_v12 }

// kernel: linguistic_encoder_forward.11
= control target key start
LH: loop header
LB: loop body
LE: loop exit
PB: predicated region body
PF: predicated region fallthrough
CT: control target
= control target key end

     0   :  { %v248_v0 = vmov 0.0   ;;  %vm249_vm0 = vmmov 0   ;;  %vm43_vm1 = vcmask 261120   ;;  %vm110_vm2 = vcmask 523264   ;;  %s357_s1 = inlined_call_operand.vmem [shape: f32[32,64], index: 1, kind: input, shape index: {}]   ;;  %s358_s3 = inlined_call_operand.vmem [shape: f32[64,32], index: 3, kind: input, shape index: {}]   ;;  %s359_s0 = inlined_call_operand.vmem [shape: f32[16,32], index: 0, kind: input, shape index: {}]   ;;  %s360_s2 = inlined_call_operand.vmem [shape: f32[1,64], index: 2, kind: input, shape index: {}]   ;;  %s361_s4 = inlined_call_operand.vmem [shape: f32[1,32], index: 4, kind: input, shape index: {}]   ;;  %s362_s5 = inlined_call_operand.vmem [shape: f32[1,32], index: 5, kind: input, shape index: {}]   ;;  %s363_s6 = inlined_call_operand.vmem [shape: f32[1,32], index: 6, kind: input, shape index: {}]   ;;  %s364_s7 = inlined_call_operand.vmem [shape: f32[16,32], index: 7, kind: output, shape index: {}]  }
   0x1   :  { %222 = vmatprep.subr.bf16.mxu0 %v248_v0  ;;  %v32_v1 = vld [vmem:[%s357_s1 + $0x10] sm:$0xff]  ;;  %v33_v2 = vld [vmem:[%s357_s1 + $0x18] sm:$0xff]  ;;  %v30_v3 = vld [vmem:[%s357_s1] sm:$0xff]  ;;  %226 = vmatprep.mubr.msk.bf16.mxu0 %vm249_vm0, %v248_v0 }
   0x2   :  { %v35_v4 = vpack.c.bf16 %v33_v2, %v32_v1  ;;  %v31_v5 = vld [vmem:[%s357_s1 + $0x8] sm:$0xff]  ;;  %230 = vmatprep.subr.bf16.mxu1 %v248_v0  ;;  %238 = vmatprep.mubr.msk.bf16.mxu1 %vm249_vm0, %v248_v0  ;;  %v97_v6 = vld [vmem:[%s358_s3 + $0x30] sm:$0xff]  ;;  %v98_v7 = vld [vmem:[%s358_s3 + $0x38] sm:$0xff] }
   0x3   :  { %v34_v8 = vpack.c.bf16 %v31_v5, %v30_v3  ;;  %v27_v9 = vld [vmem:[%s359_s0] sm:$0xff]  ;;  %v28_v10 = vld [vmem:[%s359_s0 + $0x8] sm:$0xff]  ;;  %v102_v11 = vpack.c.bf16 %v98_v7, %v97_v6  ;;  %v93_v16 = vld [vmem:[%s358_s3 + $0x10] sm:$0xff] }
   0x4   :  { %223 = vmatpush3.bf16.msra.mxu0 %v35_v4  ;;  %v29_v12 = vpack.c.bf16 %v28_v10, %v27_v9  ;;  %v95_v13 = vld [vmem:[%s358_s3 + $0x20] sm:$0xff]  ;;  %v96_v14 = vld [vmem:[%s358_s3 + $0x28] sm:$0xff]  ;;  %v94_v17 = vld [vmem:[%s358_s3 + $0x18] sm:$0xff] }
   0x5   :  { %224 = vmatprep.subr.bf16.mxu0 %v248_v0  ;;  %231 = vmatpush3.bf16.msra.mxu1 %v102_v11  ;;  %v101_v15 = vpack.c.bf16 %v96_v14, %v95_v13  ;;  %v100_v18 = vpack.c.bf16 %v94_v17, %v93_v16  ;;  %v91_v19 = vld [vmem:[%s358_s3] sm:$0xff]  ;;  %v92_v20 = vld [vmem:[%s358_s3 + $0x8] sm:$0xff] }
   0x6   :  { %232 = vmatprep.subr.bf16.mxu1 %v248_v0  ;;  %v99_v21 = vpack.c.bf16 %v92_v20, %v91_v19  ;;  %v208_v22 = vld [vmem:[%s360_s2] ss:$0 sm:$0xff] }
   0x7   :  { %v210_v32 = vld [vmem:[%s361_s4] ss:$0 sm:$0xff] }
   0x8   :  { %225 = vmatpush3.bf16.msra.mxu0 %v34_v8  ;;  %v212_v60 = vld [vmem:[%s362_s5] ss:$0 sm:$0xff] }
   0x9   :  { %233 = vmatpush3.bf16.msra.mxu1 %v101_v15  ;;  %v213_v62 = vld [vmem:[%s363_s6] ss:$0 sm:$0xff] }
   0xa   :  { %234 = vmatprep.subr.bf16.mxu1 %v248_v0 }
   0xb   :  { %227 = vmatmul.mubr.msk.bf16.vlgmr.msra.gmra.mxu0 %vm43_vm1, %v29_v12 }
   0xd   :  { %235 = vmatpush3.bf16.msra.mxu1 %v100_v18 }
   0xe   :  { %236 = vmatprep.subr.bf16.mxu1 %v248_v0 }
  0x11   :  { %237 = vmatpush3.bf16.msra.mxu1 %v99_v21 }
  0xcb   :  { %v81_v23 = vpop.f32.mrf.mxu0 }
  0xcc   :  { %v82_v25 = vadd.f32 %v208_v22, %v81_v23 }
  0xcd   :  { %v228_v24 = vpop.f32.mrf.mxu0 }
  0xce   :  { %v88_v29 = vmax.f32 %v82_v25, 0.0 }
  0xcf   :  { %v84_v26 = vpop.f32.mrf.mxu0 }
  0xd0   :  { %v85_v27 = vadd.f32 %v208_v22, %v84_v26 }
  0xd1   :  { %v229_v28 = vpop.f32.mrf.mxu0 }
  0xd2   :  { %v89_v30 = vmax.f32 %v85_v27, 0.0 }
  0xd4   :  { %v90_v31 = vpack.c.bf16 %v89_v30, %v88_v29 }
  0xd6   :  { %239 = vmatmul.mubr.msk.bf16.vlgmr.msra.gmra.mxu1 %vm110_vm2, %v90_v31 }
 0x196   :  { %v148_v33 = vpop.f32.mrf.mxu1 }
 0x197   :  { %v149_v34 = vadd.f32 %v210_v32, %v148_v33 }
 0x198   :  { %v240_v35 = vpop.f32.mrf.mxu1 }
 0x199   :  { %v155_v36 = vadd.f32 %v149_v34, %v27_v9 }
 0x19a   :  { %v151_v37 = vpop.f32.mrf.mxu1 }
 0x19b   :  { %v152_v38 = vadd.f32 %v210_v32, %v151_v37  ;;  %v157_v39 = vsel %vm43_vm1, %v155_v36, 0.0 }
 0x19c   :  { %158 = vadd.xlane.f32.xlu0 %v157_v39  ;;  %v241_v40 = vpop.f32.mrf.mxu1 }
 0x19d   :  { %v156_v41 = vadd.f32 %v152_v38, %v28_v10 }
 0x19f   :  { %v160_v42 = vsel %vm43_vm1, %v156_v41, 0.0 }
 0x1a0   :  { %161 = vadd.xlane.f32.xlu0 %v160_v42 }
 0x225   :  { %v159_v43 = vpop.xlane.xlu0 %158 }
 0x226   :  { %v164_v44 = vmul.f32 0.03125, %v159_v43 }
 0x228   :  { %v166_v45 = vsub.f32 %v155_v36, %v164_v44 }
 0x229   :  { %v162_v46 = vpop.xlane.xlu0 %161 }
 0x22a   :  { %v165_v47 = vmul.f32 0.03125, %v162_v46  ;;  %v168_v48 = vmul.f32 %v166_v45, %v166_v45 }
 0x22c   :  { %v167_v49 = vsub.f32 %v156_v41, %v165_v47  ;;  %v170_v50 = vsel %vm43_vm1, %v168_v48, 0.0 }
 0x22d   :  { %171 = vadd.xlane.f32.xlu1 %v170_v50 }
 0x22e   :  { %v169_v51 = vmul.f32 %v167_v49, %v167_v49 }
 0x230   :  { %v173_v52 = vsel %vm43_vm1, %v169_v51, 0.0 }
 0x231   :  { %174 = vadd.xlane.f32.xlu1 %v173_v52 }
 0x2b6   :  { %v172_v53 = vpop.xlane.xlu1 %171 }
 0x2b7   :  { %v176_v54 = vmul.f32 0.03125, %v172_v53 }
 0x2b9   :  { %v178_v55 = vadd.f32 1e-05, %v176_v54 }
 0x2ba   :  { %v175_v56 = vpop.xlane.xlu1 %174 }
 0x2bb   :  { %244 = vrsqrt.f32 %v178_v55  ;;  %v177_v57 = vmul.f32 0.03125, %v175_v56 }
 0x2bd   :  { %v179_v58 = vadd.f32 1e-05, %v177_v57 }
 0x2bf   :  { %246 = vrsqrt.f32 %v179_v58 }
 0x2c8   :  { %v245_v59 = vpop.eup %244 }
 0x2c9   :  { %v182_v61 = vmul.f32 %v245_v59, %v166_v45 }
 0x2cb   :  { %v191_v63 = vmul.f32 %v212_v60, %v182_v61 }
 0x2cc   :  { %v247_v0 = vpop.eup %246 }
 0x2cd   :  { %v200_v1 = vadd.f32 %v213_v62, %v191_v63  ;;  %v183_v2 = vmul.f32 %v247_v0, %v167_v49 }
 0x2cf   :  { %202 = vst.msk [vmem:[%s364_s7] sm:$0xff] %vm43_vm1, %v200_v1  ;;  %v192_v3 = vmul.f32 %v212_v60, %v183_v2 }
 0x2d1   :  { %v201_v4 = vadd.f32 %v213_v62, %v192_v3 }
 0x2d3   :  { %203 = vst.msk [vmem:[%s364_s7 + $0x8] sm:$0xff] %vm43_vm1, %v201_v4 }

// kernel: linguistic_encoder_forward.10
= control target key start
LH: loop header
LB: loop body
LE: loop exit
PB: predicated region body
PF: predicated region fallthrough
CT: control target
= control target key end

     0   :  { %s1150_s24 = smov 0   ;;  %s1279_s0 = inlined_call_operand.vmem [shape: f32[2,8,96], index: 0, kind: input, shape index: {}]   ;;  %s1280_s1 = inlined_call_operand.vmem [shape: f32[2,8,32], index: 1, kind: input, shape index: {}]   ;;  %s1281_s2 = inlined_call_operand.vmem [shape: f32[2,1,8], index: 2, kind: input, shape index: {}]   ;;  %s1282_s3 = inlined_call_operand.vmem [shape: f32[32,32], index: 3, kind: input, shape index: {}]   ;;  %s1283_s4 = inlined_call_operand.vmem [shape: f32[1,32], index: 4, kind: input, shape index: {}]   ;;  %s1284_s5 = inlined_call_operand.vmem [shape: f32[1,32], index: 5, kind: input, shape index: {}]   ;;  %s1285_s6 = inlined_call_operand.vmem [shape: f32[1,32], index: 6, kind: input, shape index: {}]   ;;  %s1286_s7 = inlined_call_operand.vmem [shape: f32[2,8,32], index: 7, kind: output, shape index: {}]  }
   0x1 LB: > { %s946_s25 = sadd.s32 4294967295, %s1092_s24   ;;  %p950_p0 = scmp.ge.s32.totalorder %s1092_s24, 1  ;;  %s1092_s24 = sphi %s1150_s24, %s17_s24  }
   0x2   : > { %p253_p1 = scmp.lt.s32.totalorder %s1092_s24, 3 }
   0x4   : > { %p254_p2 = pnand %p950_p0, %p253_p1 }
   0x5   : > { %p290_p3 = scmp.lt.s32.totalorder (!%p254_p2), %s946_s25, 1  ;;  %s1096_s30 = smov (!%p254_p2), 96  }
   0x6   : > { %257 = sbr.rel (%p254_p2) target bundleno = 2048 (0x800), region = 48  ;;  %s1097_s8 = smov (!%p254_p2), 64  }
   0x7   : > { %s1098_s9 = smov (!%p254_p2), 88   ;;  %s1099_s13 = smov (!%p254_p2), 72  }
   0x8   : > { %s1100_s14 = smov (!%p254_p2), 120   ;;  %s1101_s15 = smov (!%p254_p2), 80  }
   0x9   : > { %s1102_s16 = smov (!%p254_p2), 112   ;;  %s1103_s17 = smov (!%p254_p2), 104  }
   0xa   : > { %s1104_s18 = smov (!%p254_p2), 56   ;;  %s1105_s19 = smov (!%p254_p2), 48  }
   0xb   : > { %v1094_v0 = vmov 0.0   ;;  %vm1095_vm0 = vmmov 0   ;;  %s1288_s25 = smov (!%p290_p3, %s946_s25), 1  ;;  %vm312_vm1 = vcmask 64512   ;;  %vm384_vm2 = vcmask 1043456   ;;  %s1106_s20 = smov 40  }
   0xc   : > { %988 = vmatprep.subr.bf16.mxu0 %v1094_v0  ;;  %990 = vmatprep.mubr.msk.bf16.mxu0 %vm1095_vm0, %v1094_v0  ;;  %s1164_s26 = sshll.u32 %s1288_s25, 3  ;;  %s300_s12 = scalar_lea.vmem %s1281_s2, %s1288_s25  ;;  %vm777_vm3 = vcmask 130048   ;;  %vm779_vm4 = vcmask 195584   ;;  %vm795_vm5 = vcmask 261120  }
   0xd   : > { %994 = vmatprep.subr.bf16.mxu1 %v1094_v0  ;;  %996 = vmatprep.mubr.msk.bf16.mxu1 %vm1095_vm0, %v1094_v0  ;;  %s293_s29 = scalar_lea.vmem %s1279_s0, %s1164_s26  ;;  %v1184_v6 = vld [vmem:[%s300_s12] ss:$0 sm:$0xff]  ;;  %s1107_s21 = smov 8  }
   0xe   : > { %v306_v1 = vld [vmem:[%s293_s29] sm:$0xff]  ;;  %s1109_s10 = smov 24   ;;  %s304_s22 = scalar_lea.vmem %s1286_s7, %s1164_s26 }
   0xf   : > { %v1170_v2 = vpack.c.bf16 %v306_v1, %v306_v1 }
  0x11   : > { %310 = vrot.lane.b32.xlu0 %v1170_v2, %s1096_s30  ;;  %379 = vrot.lane.b32.xlu1 %v1170_v2, %s1097_s8 }
  0x15   : > { %430 = vrot.lane.b32.xlu1 %v1170_v2, %s1098_s9  ;;  %s1108_s9 = smov 16  }
  0x83   : > { %v311_v3 = vpop.permute.xlu0 %310  ;;  %v380_v13 = vpop.permute.xlu1 %379 }
  0x84   : > { %v317_v4 = vsel %vm312_vm1, %v311_v3, 0  ;;  %v386_v14 = vsel %vm384_vm2, %v380_v13, 0 }
  0x85   : > { %989 = vmatpush3.bf16.xpose.msra.mxu0 %v317_v4  ;;  %995 = vmatpush3.bf16.msra.mxu1 %v386_v14 }
  0x86   : > { %1006 = vmatprep.subr.bf16.mxu0 %v1094_v0  ;;  %1000 = vmatprep.subr.bf16.mxu1 %v1094_v0 }
  0x87   : > { %v431_v20 = vpop.permute.xlu1 %430 }
  0x88   : > { %v436_v26 = vsel %vm312_vm1, %v431_v20, 0 }
  0x8c   : > { %991 = vmatmul.mubr.msk.bf16.vlgmr.msra.gmra.mxu0 %vm312_vm1, %v1170_v2 }
  0x8d   : > { %1008 = vmatprep.mubr.msk.bf16.mxu0 %vm1095_vm0, %v1094_v0 }
 0x14c   : > { %v353_v5 = vpop.f32.mrf.mxu0 }
 0x14d   : > { %v359_v7 = vmul.f32 0.35355338, %v353_v5 }
 0x14e   : > { %v992_v8 = vpop.f32.mrf.mxu0 }
 0x14f   : > { %v366_v9 = vadd.f32 %v1184_v6, %v359_v7 }
 0x150   : > { %v356_v10 = vpop.f32.mrf.mxu0 }
 0x151   : > { %v367_v11 = vsel %vm312_vm1, %v366_v9, -inf }
 0x152   : > { %368 = vmax.xlane.f32.xlu0 %v367_v11  ;;  %v993_v12 = vpop.f32.mrf.mxu0 }
 0x168   : > { %654 = vrot.lane.b32.xlu0 %v1170_v2, %s1099_s13  ;;  %s297_s13 = scalar_lea.vmem %s1280_s1, %s1164_s26 }
 0x1db   : > { %v369_v15 = vpop.xlane.xlu0 %368 }
 0x1dc   : > { %v370_v16 = vsub.f32 %v366_v9, %v369_v15 }
 0x1de   : > { %v371_v17 = vmul.f32 1.442695, %v370_v16 }
 0x1df   : > { %v655_v29 = vpop.permute.xlu0 %654 }
 0x1e0   : > { %1068 = vpow2.f32 %v371_v17  ;;  %v660_v31 = vsel %vm312_vm1, %v655_v29, 0 }
 0x1ed   : > { %v1069_v18 = vpop.eup %1068 }
 0x1ee   : > { %v373_v19 = vsel %vm312_vm1, %v1069_v18, 0.0 }
 0x1ef   : > { %374 = vadd.xlane.f32.xlu1 %v373_v19 }
 0x200   : > { %428 = vrot.lane.b32.xlu1 %v1170_v2, %s1100_s14 }
 0x204   : > { %542 = vrot.lane.b32.xlu1 %v1170_v2, %s1101_s15 }
 0x208   : > { %540 = vrot.lane.b32.xlu1 %v1170_v2, %s1102_s16 }
 0x20c   : > { %652 = vrot.lane.b32.xlu1 %v1170_v2, %s1103_s17 }
 0x278   : > { %v375_v21 = vpop.xlane.xlu1 %374 }
 0x279   : > { %1070 = vrcp.f32 %v375_v21 }
 0x27c   : > { %v429_v24 = vpop.permute.xlu1 %428 }
 0x280   : > { %v543_v27 = vpop.permute.xlu1 %542 }
 0x281   : > { %v548_v28 = vsel %vm312_vm1, %v543_v27, 0 }
 0x284   : > { %v541_v30 = vpop.permute.xlu1 %540 }
 0x286   : > { %v1071_v22 = vpop.eup %1070 }
 0x287   : > { %v377_v23 = vmul.f32 %v1071_v22, %v1069_v18 }
 0x288   : > { %v653_v32 = vpop.permute.xlu1 %652 }
 0x289   : > { %v378_v25 = vpack.c.bf16 %v377_v23, %v377_v23 }
 0x28b   : > { %997 = vmatmul.mubr.msk.bf16.vlgmr.msra.gmra.mxu1 %vm312_vm1, %v378_v25 }
 0x28c   : > { %1001 = vmatpush3.bf16.xpose.msra.mxu1 %v436_v26  ;;  %1002 = vmatprep.mubr.msk.bf16.mxu1 %vm1095_vm0, %v1094_v0 }
 0x28d   : > { %1012 = vmatprep.subr.bf16.mxu1 %v1094_v0 }
 0x293   : > { %1003 = vmatmul.mubr.msk.bf16.vlgmr.msra.gmra.mxu1 %vm312_vm1, %v429_v24 }
 0x294   : > { %1013 = vmatpush3.bf16.xpose.msra.mxu1 %v548_v28  ;;  %1014 = vmatprep.mubr.msk.bf16.mxu1 %vm1095_vm0, %v1094_v0 }
 0x295   : > { %1024 = vmatprep.subr.bf16.mxu1 %v1094_v0 }
 0x29b   : > { %1015 = vmatmul.mubr.msk.bf16.vlgmr.msra.gmra.mxu1 %vm312_vm1, %v541_v30 }
 0x29c   : > { %1025 = vmatpush3.bf16.xpose.msra.mxu1 %v660_v31  ;;  %1026 = vmatprep.mubr.msk.bf16.mxu1 %vm1095_vm0, %v1094_v0 }
 0x29d   : > { %1036 = vmatprep.subr.bf16.mxu1 %v1094_v0 }
 0x2a3   : > { %1027 = vmatmul.mubr.msk.bf16.vlgmr.msra.gmra.mxu1 %vm312_vm1, %v653_v32  ;;  %v784_v32 = vld [vmem:[%s1282_s3 + $0x10] sm:$0xff] }
 0x2a4   : > { %1040 = vmatprep.mubr.msk.bf16.mxu1 %vm1095_vm0, %v1094_v0 }
 0x34b   : > { %v1214_v33 = vpop.f32.mrf.mxu1 }
 0x34d   : > { %v998_v34 = vpop.f32.mrf.mxu1 }
 0x34e   : > { %v785_v34 = vld [vmem:[%s1282_s3 + $0x18] sm:$0xff] }
 0x34f   : > { %v425_v35 = vpop.f32.mrf.mxu1 }
 0x350   : > { %v782_v35 = vld [vmem:[%s1282_s3] sm:$0xff] }
 0x351   : > { %v999_v36 = vpop.f32.mrf.mxu1 }
 0x352   : > { %v787_v36 = vpack.c.bf16 %v785_v34, %v784_v32 }
 0x353   : > { %v472_v37 = vpop.f32.mrf.mxu1 }
 0x354   : > { %v478_v38 = vmul.f32 0.35355338, %v472_v37  ;;  %v783_v37 = vld [vmem:[%s1282_s3 + $0x8] sm:$0xff]  ;;  %1037 = vmatpush3.bf16.msra.mxu1 %v787_v36 }
 0x355   : > { %v1004_v39 = vpop.f32.mrf.mxu1  ;;  %1038 = vmatprep.subr.bf16.mxu1 %v1094_v0 }
 0x356   : > { %v479_v40 = vadd.f32 %v1184_v6, %v478_v38  ;;  %v786_v38 = vpack.c.bf16 %v783_v37, %v782_v35 }
 0x357   : > { %v475_v41 = vpop.f32.mrf.mxu1 }
 0x358   : > { %v480_v42 = vsel %vm312_vm1, %v479_v40, -inf  ;;  %1039 = vmatpush3.bf16.msra.mxu1 %v786_v38 }
 0x359   : > { %481 = vmax.xlane.f32.xlu1 %v480_v42  ;;  %v1005_v43 = vpop.f32.mrf.mxu1 }
 0x35b   : > { %v584_v44 = vpop.f32.mrf.mxu1 }
 0x35c   : > { %v590_v45 = vmul.f32 0.35355338, %v584_v44 }
 0x35d   : > { %v1016_v46 = vpop.f32.mrf.mxu1 }
 0x35e   : > { %v591_v47 = vadd.f32 %v1184_v6, %v590_v45 }
 0x35f   : > { %v587_v48 = vpop.f32.mrf.mxu1 }
 0x360   : > { %v592_v49 = vsel %vm312_vm1, %v591_v47, -inf }
 0x361   : > { %593 = vmax.xlane.f32.xlu0 %v592_v49  ;;  %v1017_v50 = vpop.f32.mrf.mxu1 }
 0x363   : > { %v696_v51 = vpop.f32.mrf.mxu1 }
 0x364   : > { %v702_v52 = vmul.f32 0.35355338, %v696_v51 }
 0x365   : > { %v1028_v53 = vpop.f32.mrf.mxu1 }
 0x366   : > { %v703_v54 = vadd.f32 %v1184_v6, %v702_v52  ;;  %v963_v53 = vld [vmem:[%s1283_s4] ss:$0 sm:$0xff] }
 0x367   : > { %v699_v55 = vpop.f32.mrf.mxu1 }
 0x368   : > { %v704_v56 = vsel %vm312_vm1, %v703_v54, -inf  ;;  %v839_v55 = vld [vmem:[%s297_s13] sm:$0xff] }
 0x369   : > { %705 = vmax.xlane.f32.xlu1 %v704_v56  ;;  %v1029_v57 = vpop.f32.mrf.mxu1 }
 0x3e2   : > { %v482_v58 = vpop.xlane.xlu1 %481 }
 0x3e3   : > { %v483_v59 = vsub.f32 %v479_v40, %v482_v58 }
 0x3e5   : > { %v484_v60 = vmul.f32 1.442695, %v483_v59 }
 0x3e7   : > { %1072 = vpow2.f32 %v484_v60 }
 0x3ea   : > { %v594_v6 = vpop.xlane.xlu0 %593 }
 0x3eb   : > { %v595_v7 = vsub.f32 %v591_v47, %v594_v6 }
 0x3ed   : > { %v596_v8 = vmul.f32 1.442695, %v595_v7 }
 0x3f2   : > { %v706_v61 = vpop.xlane.xlu1 %705 }
 0x3f3   : > { %v707_v62 = vsub.f32 %v703_v54, %v706_v61 }
 0x3f4   : > { %v1073_v63 = vpop.eup %1072 }
 0x3f5   : > { %v708_v1 = vmul.f32 1.442695, %v707_v62  ;;  %v486_v3 = vsel %vm312_vm1, %v1073_v63, 0.0 }
 0x3f6   : > { %487 = vadd.xlane.f32.xlu1 %v486_v3 }
 0x3f7   : > { %1074 = vpow2.f32 %v708_v1 }
 0x3f8   : > { %1076 = vpow2.f32 %v596_v8  ;;  %v965_v8 = vld [vmem:[%s1284_s5] ss:$0 sm:$0xff] }
 0x404   : > { %v1075_v4 = vpop.eup %1074 }
 0x405   : > { %v710_v5 = vsel %vm312_vm1, %v1075_v4, 0.0  ;;  %v1077_v9 = vpop.eup %1076 }
 0x406   : > { %711 = vadd.xlane.f32.xlu0 %v710_v5  ;;  %v598_v10 = vsel %vm312_vm1, %v1077_v9, 0.0 }
 0x407   : > { %492 = vrot.lane.b32.xlu1 %v1170_v2, %s1104_s18 }
 0x41c   : > { %604 = vrot.lane.b32.xlu0 %v1170_v2, %s1105_s19 }
 0x42b   : > { %599 = vadd.xlane.f32.xlu1 %v598_v10  ;;  %v966_v10 = vld [vmem:[%s1285_s6] ss:$0 sm:$0xff] }
 0x43c   : > { %716 = vrot.lane.b32.xlu1 %v1170_v2, %s1106_s20 }
 0x47f   : > { %v488_v11 = vpop.xlane.xlu1 %487 }
 0x480   : > { %1078 = vrcp.f32 %v488_v11 }
 0x483   : > { %v493_v12 = vpop.permute.xlu1 %492 }
 0x484   : > { %v498_v13 = vsel %vm384_vm2, %v493_v12, 0 }
 0x485   : > { %1007 = vmatpush3.bf16.msra.mxu0 %v498_v13 }
 0x486   : > { %1018 = vmatprep.subr.bf16.mxu0 %v1094_v0 }
 0x48d   : > { %v1079_v14 = vpop.eup %1078 }
 0x48e   : > { %v490_v15 = vmul.f32 %v1079_v14, %v1073_v63 }
 0x48f   : > { %v712_v16 = vpop.xlane.xlu0 %711 }
 0x490   : > { %v491_v17 = vpack.c.bf16 %v490_v15, %v490_v15 }
 0x492   : > { %1009 = vmatmul.mubr.msk.bf16.vlgmr.msra.gmra.mxu0 %vm312_vm1, %v491_v17 }
 0x493   : > { %v605_v18 = vpop.permute.xlu0 %604  ;;  %1020 = vmatprep.mubr.msk.bf16.mxu0 %vm1095_vm0, %v1094_v0 }
 0x494   : > { %v610_v2 = vsel %vm384_vm2, %v605_v18, 0 }
 0x495   : > { %1019 = vmatpush3.bf16.msra.mxu0 %v610_v2 }
 0x496   : > { %1030 = vmatprep.subr.bf16.mxu0 %v1094_v0 }
 0x4b4   : > { %v600_v19 = vpop.xlane.xlu1 %599 }
 0x4b5   : > { %1080 = vrcp.f32 %v600_v19 }
 0x4b6   : > { %1082 = vrcp.f32 %v712_v16 }
 0x4b8   : > { %v717_v21 = vpop.permute.xlu1 %716 }
 0x4b9   : > { %v722_v23 = vsel %vm384_vm2, %v717_v21, 0 }
 0x4c2   : > { %v1081_v20 = vpop.eup %1080 }
 0x4c3   : > { %v602_v22 = vmul.f32 %v1081_v20, %v1077_v9  ;;  %v1083_v25 = vpop.eup %1082 }
 0x4c4   : > { %v714_v26 = vmul.f32 %v1083_v25, %v1075_v4 }
 0x4c5   : > { %v603_v24 = vpack.c.bf16 %v602_v22, %v602_v22 }
 0x4c6   : > { %v715_v27 = vpack.c.bf16 %v714_v26, %v714_v26 }
 0x4c7   : > { %1021 = vmatmul.mubr.msk.bf16.vlgmr.msra.gmra.mxu0 %vm312_vm1, %v603_v24 }
 0x4c8   : > { %1031 = vmatpush3.bf16.msra.mxu0 %v722_v23  ;;  %1032 = vmatprep.mubr.msk.bf16.mxu0 %vm1095_vm0, %v1094_v0 }
 0x4cf   : > { %1033 = vmatmul.mubr.msk.bf16.vlgmr.msra.gmra.mxu0 %vm312_vm1, %v715_v27 }
 0x552   : > { %v534_v28 = vpop.f32.mrf.mxu0 }
 0x553   : > { %765 = vrot.lane.b32.xlu1 %v534_v28, %s1107_s21 }
 0x554   : > { %v1010_v29 = vpop.f32.mrf.mxu0 }
 0x556   : > { %v537_v30 = vpop.f32.mrf.mxu0 }
 0x558   : > { %v1011_v31 = vpop.f32.mrf.mxu0 }
 0x587   : > { %v646_v39 = vpop.f32.mrf.mxu0 }
 0x588   : > { %769 = vrot.lane.b32.xlu0 %v646_v39, %s1108_s9 }
 0x589   : > { %v1022_v40 = vpop.f32.mrf.mxu0 }
 0x58b   : > { %v649_v41 = vpop.f32.mrf.mxu0 }
 0x58d   : > { %v1023_v42 = vpop.f32.mrf.mxu0 }
 0x58f   : > { %v758_v43 = vpop.f32.mrf.mxu0 }
 0x590   : > { %773 = vrot.lane.b32.xlu1 %v758_v43, %s1109_s10 }
 0x591   : > { %v1034_v44 = vpop.f32.mrf.mxu0 }
 0x593   : > { %v761_v45 = vpop.f32.mrf.mxu0 }
 0x595   : > { %v1035_v46 = vpop.f32.mrf.mxu0 }
 0x5c5   : > { %v766_v47 = vpop.permute.xlu1 %765 }
 0x5c6   : > { %v776_v0 = vsel %vm312_vm1, %v1214_v33, %v766_v47 }
 0x5fa   : > { %v770_v48 = vpop.permute.xlu0 %769 }
 0x5fb   : > { %v778_v49 = vsel %vm777_vm3, %v776_v0, %v770_v48 }
 0x602   : > { %v774_v50 = vpop.permute.xlu1 %773 }
 0x603   : > { %v780_v51 = vsel %vm779_vm4, %v778_v49, %v774_v50 }
 0x604   : > { %v781_v52 = vpack.c.bf16 %v780_v51, %v780_v51 }
 0x606   : > { %1041 = vmatmul.mubr.msk.bf16.vlgmr.msra.gmra.mxu1 %vm795_vm5, %v781_v52 }
 0x6c6   : > { %v833_v54 = vpop.f32.mrf.mxu1 }
 0x6c7   : > { %v834_v56 = vadd.f32 %v963_v53, %v833_v54 }
 0x6c8   : > { %v1042_v57 = vpop.f32.mrf.mxu1 }
 0x6c9   : > { %v840_v33 = vadd.f32 %v839_v55, %v834_v56 }
 0x6ca   : > { %v836_v58 = vpop.f32.mrf.mxu1 }
 0x6cb   : > { %v841_v59 = vsel %vm795_vm5, %v840_v33, 0.0 }
 0x6cc   : > { %842 = vadd.xlane.f32.xlu0 %v841_v59  ;;  %v1043_v60 = vpop.f32.mrf.mxu1 }
 0x755   : > { %v843_v61 = vpop.xlane.xlu0 %842 }
 0x756   : > { %v845_v62 = vmul.f32 0.03125, %v843_v61 }
 0x758   : > { %v846_v63 = vsub.f32 %v840_v33, %v845_v62 }
 0x75a   : > { %v847_v1 = vmul.f32 %v846_v63, %v846_v63 }
 0x75c   : > { %v848_v3 = vsel %vm795_vm5, %v847_v1, 0.0 }
 0x75d   : > { %849 = vadd.xlane.f32.xlu1 %v848_v3 }
 0x7e6   : > { %v850_v4 = vpop.xlane.xlu1 %849 }
 0x7e7   : > { %v851_v5 = vmul.f32 0.03125, %v850_v4 }
 0x7e9   : > { %v852_v6 = vadd.f32 1e-05, %v851_v5 }
 0x7eb   : > { %1084 = vrsqrt.f32 %v852_v6 }
 0x7f8   : > { %v1085_v7 = vpop.eup %1084 }
 0x7f9   : > { %v854_v9 = vmul.f32 %v1085_v7, %v846_v63 }
 0x7fb   : > { %v862_v11 = vmul.f32 %v965_v8, %v854_v9 }
 0x7fd   : > { %v870_v12 = vadd.f32 %v966_v10, %v862_v11 }
 0x7ff   : > { %871 = vst.msk [vmem:[%s304_s22] sm:$0xff] %vm795_vm5, %v870_v12 }
 0x800 PF: > { %s17_s24 = sadd.s32 1, %s1092_s24  }
 0x801   : > { %p14_p4 = scmp.ge.s32.totalorder %s17_s24, 4  }
 0x803   :  { %16 = sbr.rel (!%p14_p4) target bundleno = 1 (0x1), region = 84 }

// kernel: linguistic_encoder_forward.15
= control target key start
LH: loop header
LB: loop body
LE: loop exit
PB: predicated region body
PF: predicated region fallthrough
CT: control target
= control target key end

     0   :  { %v173_v3 = vmov 0.0   ;;  %vm174_vm0 = vmmov 0   ;;  %s239_s0 = inlined_call_operand.vmem [shape: f32[16,32], index: 0, kind: input, shape index: {}]   ;;  %s240_s1 = inlined_call_operand.vmem [shape: f32[32,32], index: 1, kind: input, shape index: {}]   ;;  %s241_s2 = inlined_call_operand.vmem [shape: f32[1,32], index: 2, kind: input, shape index: {}]   ;;  %s242_s3 = inlined_call_operand.vmem [shape: f32[16,1], index: 3, kind: input, shape index: {}]   ;;  %s243_s4 = inlined_call_operand.hbm [shape: f32[16,32], index: 4, kind: output, shape index: {}]  }
   0x1   :  { %v24_v0 = vld [vmem:[%s240_s1 + $0x10] sm:$0xff]  ;;  %v25_v1 = vld [vmem:[%s240_s1 + $0x18] sm:$0xff]  ;;  %v22_v2 = vld [vmem:[%s240_s1] sm:$0xff]  ;;  %131 = vmatprep.subr.bf16.mxu0 %v173_v3  ;;  %135 = vmatprep.mubr.msk.bf16.mxu0 %vm174_vm0, %v173_v3 }
   0x2   :  { %v27_v4 = vpack.c.bf16 %v25_v1, %v24_v0  ;;  %v23_v5 = vld [vmem:[%s240_s1 + $0x8] sm:$0xff] }
   0x3   :  { %9 = vsyncpa [#allocation3], 0  ;;  %v26_v6 = vpack.c.bf16 %v23_v5, %v22_v2  ;;  %v19_v7 = vld [vmem:[%s239_s0] sm:$0xff]  ;;  %v20_v8 = vld [vmem:[%s239_s0 + $0x8] sm:$0xff]  ;;  %vm35_vm1 = vcmask 261120   ;;  %v175_v11 = vmov 0  }
   0x4   :  { %132 = vmatpush3.bf16.msra.mxu0 %v27_v4  ;;  %v21_v9 = vpack.c.bf16 %v20_v8, %v19_v7  ;;  %v94_v10 = vld [vmem:[%s242_s3] sm:$0xff]  ;;  %145 = vset.pattern.permute.xlu1 %v175_v11  ;;  %v95_v12 = vld [vmem:[%s242_s3 + $0x8] sm:$0xff] }
   0x5   :  { %133 = vmatprep.subr.bf16.mxu0 %v173_v3  ;;  %146 = vset.pattern.permute.xlu0 %v175_v11  ;;  %v126_v13 = vld [vmem:[%s241_s2] ss:$0 sm:$0xff]  ;;  %s176_s2 = smov [#allocation2]  }
   0x6   :  { %98 = vperm.xlu1 %145, %v94_v10   ;;  %s115_s3 = sshll.u32 %s176_s2, 4  ;;  %s116_s3 = int_to_ptr.vmem [resolvable:$true] %s115_s3 }
   0x7   :  { %s151_s5 = scalar_lea.vmem %s116_s3, 256  ;;  %p156_p1 = scmp.lt.s32.totalorder %s116_s3, %s116_s3 }
   0x8   :  { %134 = vmatpush3.bf16.msra.mxu0 %v26_v6  ;;  %p152_p0 = scmp.ne.s32.totalorder %s116_s3, %s151_s5  ;;  %p157_p2 = scmp.lt.s32.totalorder %s151_s5, %s151_s5 }
   0xa   :  { %103 = vperm.xlu1 %145, %v95_v12   ;;  %p158_p3 = por %p157_p2, %p156_p1 }
   0xb   :  { %136 = vmatmul.mubr.msk.bf16.vlgmr.msra.gmra.mxu0 %vm35_vm1, %v21_v9 }
   0xc   :  { %p159_p4 = pnand %p158_p3, %p152_p0 }
  0x81   :  { %v99_v29 = vpop.permute.xlu1 %98 }
  0x85   :  { %v104_v34 = vpop.permute.xlu1 %103 }
  0xcb   :  { %v73_v14 = vpop.f32.mrf.mxu0 }
  0xcc   :  { %v74_v15 = vadd.f32 %v126_v13, %v73_v14 }
  0xcd   :  { %v137_v16 = vpop.f32.mrf.mxu0 }
  0xce   :  { %v80_v17 = vmul.f32 %v74_v15, %v74_v15 }
  0xcf   :  { %v76_v18 = vpop.f32.mrf.mxu0 }
  0xd0   :  { %v77_v19 = vadd.f32 %v126_v13, %v76_v18  ;;  %v82_v20 = vsel %vm35_vm1, %v80_v17, 0.0 }
  0xd1   :  { %83 = vadd.xlane.f32.xlu0 %v82_v20  ;;  %v138_v21 = vpop.f32.mrf.mxu0 }
  0xd2   :  { %v81_v22 = vmul.f32 %v77_v19, %v77_v19 }
  0xd4   :  { %v85_v23 = vsel %vm35_vm1, %v81_v22, 0.0 }
  0xd5   :  { %86 = vadd.xlane.f32.xlu0 %v85_v23 }
 0x15a   :  { %v84_v24 = vpop.xlane.xlu0 %83 }
 0x15b   :  { %v88_v25 = vmax.f32 %v84_v24, 1e-24 }
 0x15d   :  { %147 = vrsqrt.f32 %v88_v25 }
 0x15e   :  { %v87_v26 = vpop.xlane.xlu0 %86 }
 0x15f   :  { %v89_v27 = vmax.f32 %v87_v26, 1e-24 }
 0x161   :  { %149 = vrsqrt.f32 %v89_v27 }
 0x16a   :  { %v148_v28 = vpop.eup %147 }
 0x16b   :  { %v92_v30 = vmul.f32 %v148_v28, %v74_v15 }
 0x16d   :  { %v106_v31 = vmul.f32 %v99_v29, %v92_v30 }
 0x16e   :  { %v150_v32 = vpop.eup %149 }
 0x16f   :  { %108 = vst.msk [vmem:[#allocation2] sm:$0xff] %vm35_vm1, %v106_v31  ;;  %v93_v33 = vmul.f32 %v150_v32, %v77_v19 }
 0x171   :  { %v107_v35 = vmul.f32 %v104_v34, %v93_v33 }
 0x173   :  { %109 = vst.msk [vmem:[#allocation2 + $0x8] sm:$0xff] %vm35_vm1, %v107_v35 }
 0x174   :  { %162 = shalt.err (!%p159_p4)
}
 0x175   :  { %s177_s6 = smov 128   ;;  %s178_s7 = smov 8  }
 0x176   :  { %121 = dma.vmem_to_hbm [thread:$0]  %s116_s3, 256, %s243_s4, [#allocation3], %s177_s6, %s177_s6, %s178_s7  }
 0x177   :  { %171 = dma.done.wait [#allocation3], 256  }
 0x178   :  { %172 = vsyncadd [#allocation3], 4294967040 }
 0x179   :  { %125 = vsyncpa [#allocation3], 1 }

</bundles_post_ra>
